<compile_context>
chip_gen: v7x
topology: tpu7x:2x2x1
jax: 0.10.0
libtpu: 0.0.40
codegen_flags: <defaults>
</compile_context>

<pallas_src>
import numpy as np

import jax
import jax.numpy as jnp
from jax.experimental import pallas as pl
from jax.experimental.pallas import tpu as pltpu


# ------------------------------ fused kernel --------------------------------

def _backbone_kernel(xA_ref, w1_ref, wd1_ref, w11_ref, w12_ref, w13_ref,
                     wd4_ref, w41_ref, w42_ref, w43_ref,
                     btab_ref, maskA_ref, sel_ref, maskB1_ref, maskB2_ref,
                     o_low_ref, o_out_ref):
    f32, bf16 = jnp.float32, jnp.bfloat16
    btab = btab_ref[...]                                     # (16, 128) f32

    def bias(row, width):                                    # (1, width) f32
        return btab[row:row + 1, :width]

    def mm(a, w):                                            # bf16 MXU, f32 acc
        return jnp.dot(a.astype(bf16), w, preferred_element_type=f32)

    # ---- stage A: stem conv (host im2col) + maxpool -------------------------
    # xA is the (M_A, 256) bf16 im2col slab (K = 7*7*3 = 147, zero-padded to
    # 256): the whole 7x7/s2 conv is ONE MXU matmul.
    y = jnp.maximum(
        jnp.dot(xA_ref[...], w1_ref[...], preferred_element_type=f32)
        + bias(0, 16), 0.0)                                  # (M_A, 16) f32

    # MaxPool(3x3, s2, pad1): stride-1 3x3 max via XLU rolls + per-tap masks
    # (y >= 0 post-ReLU so masked/wrapped taps contributing 0 never win), then
    # the stride-2 subsample as one block-diagonal one-hot matmul.
    WA = 8
    MA = y.shape[0]
    m = y                                                    # center tap
    taps = [(dh, dw) for dh in (-1, 0, 1) for dw in (-1, 0, 1)]
    for t, (dh, dw) in enumerate(taps):
        if dh == 0 and dw == 0:
            continue
        shifted = pltpu.roll(y, (-(dh * WA + dw)) % MA, axis=0)
        m = jnp.maximum(m, shifted * maskA_ref[t])
    x0 = jnp.dot(sel_ref[...], m.astype(bf16),
                 preferred_element_type=f32)                 # (M_B, 16) pooled

    # ---- stage B: 4x4 grid per image (two bottleneck blocks) ----------------
    WB = 4

    def conv3x3_kstack(h, w_ref, mask_ref, dil, brow, cout):
        # Build one (M, 9*Cin) operand from XLU rolls, mask once, matmul once.
        M = h.shape[0]
        offs = [dh * WB + dw for dh in (-dil, 0, dil) for dw in (-dil, 0, dil)]
        pieces = [h if o == 0 else pltpu.roll(h, (-o) % M, axis=0) for o in offs]
        stacked = jnp.concatenate(pieces, axis=-1) * mask_ref[...]
        return jnp.maximum(mm(stacked, w_ref[...]) + bias(brow, cout), 0.0)

    # layer1-style bottleneck -> 'low_level' (projection padded to 128 lanes
    # so the store is one full unmasked block).
    idn1 = mm(x0, wd1_ref[...]) + bias(1, 128)               # (M_B, 128)
    h = jnp.maximum(mm(x0, w11_ref[...]) + bias(2, 8), 0.0)
    h = conv3x3_kstack(h, w12_ref, maskB1_ref, 1, 3, 8)
    low = jnp.maximum(mm(h, w13_ref[...]) + bias(4, 128) + idn1, 0.0)
    o_low_ref[...] = low                                     # lane-dense store
    low32 = low[:, :32]                                      # true channels

    # layer4-style dilated bottleneck -> 'out'
    idn2 = mm(low32, wd4_ref[...]) + bias(5, 128)            # (M_B, 128)
    h = jnp.maximum(mm(low32, w41_ref[...]) + bias(6, 16), 0.0)
    h = conv3x3_kstack(h, w42_ref, maskB2_ref, 2, 7, 16)     # dilated 3x3
    o_out_ref[...] = jnp.maximum(mm(h, w43_ref[...]) + bias(8, 128) + idn2, 0.0)


# ------------------------------ host helpers --------------------------------

def _split_batch(B):
    # >= 2 grid blocks whenever possible so v7x's two TensorCores both get
    # work; on single-TC v5e/v6e the extra block is a negligible ~0.35 us.
    nb = 2 if (B >= 2 and B % 2 == 0) else 1
    return nb, B // nb


def _stem_im2col(x_nchw):
    """NCHW (B,3,16,16) -> (B, 64, 256) bf16 im2col slab for the 7x7/s2 stem.

    K = 7*7*3 = 147 zero-padded to 256 so the in-kernel load is lane-dense and
    the whole stem conv is a single MXU matmul (no in-kernel shifts/masks)."""
    x = jnp.transpose(x_nchw, (0, 2, 3, 1)).astype(jnp.float32)   # (B,16,16,3)
    xp = jnp.pad(x, ((0, 0), (3, 3), (3, 3), (0, 0)))             # (B,22,22,3)
    B = x.shape[0]
    taps = []
    for kh in range(7):
        for kw in range(7):
            taps.append(xp[:, kh:kh + 15:2, kw:kw + 15:2, :])     # (B,8,8,3)
    p = jnp.stack(taps, axis=3).reshape(B, 64, 7 * 7 * 3)         # (B,64,147)
    p = jnp.pad(p, ((0, 0), (0, 0), (0, 256 - 147)))
    return p.astype(jnp.bfloat16)                                  # (B,64,256)


def _pool_masks(G):
    """(9, G*64, 16) f32 pre-broadcast tap-validity masks for the 8x8 maxpool."""
    r = np.arange(64)
    h, w = r // 8, r % 8
    taps = [(dh, dw) for dh in (-1, 0, 1) for dw in (-1, 0, 1)]
    m = np.stack([((h + dh >= 0) & (h + dh < 8) & (w + dw >= 0) & (w + dw < 8))
                  for dh, dw in taps], axis=0).astype(np.float32)   # (9, 64)
    m = np.tile(m, (1, G))                                          # (9, G*64)
    return np.ascontiguousarray(np.broadcast_to(m[:, :, None], (9, G * 64, 16)))


def _sel_blockdiag(G):
    """(G*16, G*64) one-hot stride-2 subsample matrix, block-diagonal per image."""
    p = np.arange(16)
    sel0 = np.zeros((16, 64), np.float32)
    sel0[p, (2 * (p // 4)) * 8 + 2 * (p % 4)] = 1.0
    sel = np.zeros((G * 16, G * 64), np.float32)
    for g in range(G):
        sel[g * 16:(g + 1) * 16, g * 64:(g + 1) * 64] = sel0
    return sel


def _conv_mask_stacked(G, dil, cin):
    """(G*16, 9*cin) f32 mask for the K-stacked 3x3 conv operand (4x4 grid)."""
    W = 4
    r = np.arange(16)
    h, w = r // W, r % W
    taps = [(dh, dw) for dh in (-dil, 0, dil) for dw in (-dil, 0, dil)]
    cols = []
    for dh, dw in taps:
        v = ((h + dh >= 0) & (h + dh < W) &
             (w + dw >= 0) & (w + dw < W)).astype(np.float32)
        cols.append(np.repeat(v[:, None], cin, axis=1))             # (16, cin)
    return np.tile(np.concatenate(cols, axis=1), (G, 1))            # (G*16, 9*cin)


# ------------------------------ host wrapper ---------------------------------

def seg_feature_extractor(x_nchw, kp):
    """Equivalent of SegFeatureExtractor.forward: {'low_level','out'} (NCHW)."""
    B = x_nchw.shape[0]
    nb, G = _split_batch(B)
    MA, MB = G * 64, G * 16

    xA = _stem_im2col(x_nchw).reshape(nb, MA, 256)

    # Compile-time geometry constants (depend only on images-per-block G).
    maskA = jnp.asarray(_pool_masks(G))                       # (9, MA, 16) f32
    sel = jnp.asarray(_sel_blockdiag(G), jnp.bfloat16)        # (MB, MA)
    maskB1 = jnp.asarray(_conv_mask_stacked(G, 1, 8))         # (MB, 72)
    maskB2 = jnp.asarray(_conv_mask_stacked(G, 2, 16))        # (MB, 144)

    consts = [kp['w1'], kp['wd1'], kp['w11'], kp['w12k'], kp['w13'],
              kp['wd4'], kp['w41'], kp['w42k'], kp['w43'],
              kp['btab'], maskA, sel, maskB1, maskB2]

    def const_spec(a):
        if a.ndim == 2:
            return pl.BlockSpec(a.shape, lambda b: (0, 0))
        return pl.BlockSpec(a.shape, lambda b: (0, 0, 0))

    low_p, out_p = pl.pallas_call(
        _backbone_kernel,
        out_shape=(jax.ShapeDtypeStruct((nb, MB, 128), jnp.float32),
                   jax.ShapeDtypeStruct((nb, MB, 128), jnp.float32)),
        grid=(nb,),
        in_specs=[pl.BlockSpec((None, MA, 256), lambda b: (b, 0, 0))]
                 + [const_spec(a) for a in consts],
        out_specs=(pl.BlockSpec((None, MB, 128), lambda b: (b, 0, 0)),
                   pl.BlockSpec((None, MB, 128), lambda b: (b, 0, 0))),
        compiler_params=pltpu.CompilerParams(
            dimension_semantics=("parallel",)),
    )(xA, *consts)

    low = low_p.reshape(B, 16, 128)[:, :, :32].reshape(B, 4, 4, 32)
    out = out_p.reshape(B, 16, 128)[:, :, :64].reshape(B, 4, 4, 64)
    # TODO(synk): the real module returns features of a frozen pretrained
    # DeepLab ResNet/MobileNet backbone loaded from cfg['ckpt']; this is a
    # structurally faithful stand-in with deterministic weights.
    return {'low_level': jnp.transpose(low, (0, 3, 1, 2)),
            'out': jnp.transpose(out, (0, 3, 1, 2))}


# ------------------------------ parameters ----------------------------------

def make_params(key):
    keys = jax.random.split(key, 9)

    def convp(k, kh, kw, cin, cout):
        k1, k2, k3 = jax.random.split(k, 3)
        fan_in = float(kh * kw * cin)
        return {
            'w_hwio': jax.random.normal(k1, (kh, kw, cin, cout), jnp.float32)
                      / jnp.sqrt(fan_in),
            'scale': 1.0 + 0.05 * jax.random.normal(k2, (cout,), jnp.float32),
            'bias': 0.05 * jax.random.normal(k3, (cout,), jnp.float32),
        }

    return {
        'conv1':   convp(keys[0], 7, 7, 3, 16),
        'l1_down': convp(keys[1], 1, 1, 16, 32),
        'l1_c1':   convp(keys[2], 1, 1, 16, 8),
        'l1_c2':   convp(keys[3], 3, 3, 8, 8),
        'l1_c3':   convp(keys[4], 1, 1, 8, 32),
        'l4_down': convp(keys[5], 1, 1, 32, 64),
        'l4_c1':   convp(keys[6], 1, 1, 32, 16),
        'l4_c2':   convp(keys[7], 3, 3, 16, 16),
        'l4_c3':   convp(keys[8], 1, 1, 16, 64),
    }


def fold_params(p):
    """Fold inference BN into bf16 weight matrices, flatten the stem weight for
    the host im2col formulation, K-stack the 3x3 weights, and build the
    lane-dense bias table."""
    def fold(name):
        c = p[name]
        return c['w_hwio'] * c['scale'], c['bias'].astype(jnp.float32)

    # stem 7x7/s2: (7,7,3,16) -> (147,16), zero-pad K to 256 (lane-dense).
    w, b1 = fold('conv1')
    w1 = w.reshape(7 * 7 * 3, 16)
    w1 = jnp.pad(w1, ((0, 256 - 147), (0, 0))).astype(jnp.bfloat16)

    def flat1x1(name, pad_to=None):
        ww, bb = fold(name)
        ww = ww.reshape(ww.shape[2], ww.shape[3])
        if pad_to is not None:                               # lane-dense output
            ww = jnp.pad(ww, ((0, 0), (0, pad_to - ww.shape[1])))
        return ww.astype(jnp.bfloat16), bb

    def flat3x3_kstacked(name):
        ww, bb = fold(name)                                  # (3,3,cin,cout)
        return (ww.reshape(9 * ww.shape[2], ww.shape[3]).astype(jnp.bfloat16),
                bb)

    wd1, bd1 = flat1x1('l1_down', 128)
    w11, b11 = flat1x1('l1_c1')
    w12k, b12 = flat3x3_kstacked('l1_c2')                    # (72, 8)
    w13, b13 = flat1x1('l1_c3', 128)
    wd4, bd4 = flat1x1('l4_down', 128)
    w41, b41 = flat1x1('l4_c1')
    w42k, b42 = flat3x3_kstacked('l4_c2')                    # (144, 16)
    w43, b43 = flat1x1('l4_c3', 128)

    btab = jnp.zeros((16, 128), jnp.float32)
    for r, bb in enumerate([b1, bd1, b11, b12, b13, bd4, b41, b42, b43]):
        btab = btab.at[r, :bb.shape[0]].set(bb)

    return {'w1': w1, 'wd1': wd1, 'w11': w11, 'w12k': w12k, 'w13': w13,
            'wd4': wd4, 'w41': w41, 'w42k': w42k, 'w43': w43, 'btab': btab}


if __name__ == "__main__":
    key = jax.random.PRNGKey(0)
    k_x, k_p = jax.random.split(key)
    x = jax.random.normal(k_x, (2, 3, 16, 16), jnp.float32)   # NCHW, like PyTorch
    params = make_params(k_p)
    kp = fold_params(params)

    feats = jax.jit(seg_feature_extractor)(x, kp)
    feats = jax.tree_util.tree_map(jax.block_until_ready, feats)

    assert feats['low_level'].shape == (2, 32, 4, 4)
    assert feats['out'].shape == (2, 64, 4, 4)
    print("KERNEL_OK")
</pallas_src>

<mosaic_0001>
module attributes {stable_mosaic.version = 11 : i64} {
  func.func @_backbone_kernel(%arg0: i32, %arg1: memref<1x64x256xbf16, #tpu.memory_space<vmem>>, %arg2: memref<256x16xbf16, #tpu.memory_space<vmem>>, %arg3: memref<16x128xbf16, #tpu.memory_space<vmem>>, %arg4: memref<16x8xbf16, #tpu.memory_space<vmem>>, %arg5: memref<72x8xbf16, #tpu.memory_space<vmem>>, %arg6: memref<8x128xbf16, #tpu.memory_space<vmem>>, %arg7: memref<32x128xbf16, #tpu.memory_space<vmem>>, %arg8: memref<32x16xbf16, #tpu.memory_space<vmem>>, %arg9: memref<144x16xbf16, #tpu.memory_space<vmem>>, %arg10: memref<16x128xbf16, #tpu.memory_space<vmem>>, %arg11: memref<16x128xf32, #tpu.memory_space<vmem>>, %arg12: memref<9x64x16xf32, #tpu.memory_space<vmem>>, %arg13: memref<16x64xbf16, #tpu.memory_space<vmem>>, %arg14: memref<16x72xf32, #tpu.memory_space<vmem>>, %arg15: memref<16x144xf32, #tpu.memory_space<vmem>>, %arg16: memref<1x16x128xf32, #tpu.memory_space<vmem>>, %arg17: memref<1x16x128xf32, #tpu.memory_space<vmem>>) attributes {dimension_semantics = [#tpu.dimension_semantics<parallel>], iteration_bounds = array<i64: 2>, scalar_prefetch = 0 : i64, scratch_operands = 0 : i64, tpu.core_type = #tpu.core_type<tc>, window_params = [{transform_indices = @transform_0, window_bounds = array<i64: 1, 64, 256>}, {pipeline_mode = #tpu.pipeline_mode<synchronous>, transform_indices = @transform_1, window_bounds = array<i64: 256, 16>}, {pipeline_mode = #tpu.pipeline_mode<synchronous>, transform_indices = @transform_2, window_bounds = array<i64: 16, 128>}, {pipeline_mode = #tpu.pipeline_mode<synchronous>, transform_indices = @transform_3, window_bounds = array<i64: 16, 8>}, {pipeline_mode = #tpu.pipeline_mode<synchronous>, transform_indices = @transform_4, window_bounds = array<i64: 72, 8>}, {pipeline_mode = #tpu.pipeline_mode<synchronous>, transform_indices = @transform_5, window_bounds = array<i64: 8, 128>}, {pipeline_mode = #tpu.pipeline_mode<synchronous>, transform_indices = @transform_6, window_bounds = array<i64: 32, 128>}, {pipeline_mode = #tpu.pipeline_mode<synchronous>, transform_indices = @transform_7, window_bounds = array<i64: 32, 16>}, {pipeline_mode = #tpu.pipeline_mode<synchronous>, transform_indices = @transform_8, window_bounds = array<i64: 144, 16>}, {pipeline_mode = #tpu.pipeline_mode<synchronous>, transform_indices = @transform_9, window_bounds = array<i64: 16, 128>}, {pipeline_mode = #tpu.pipeline_mode<synchronous>, transform_indices = @transform_10, window_bounds = array<i64: 16, 128>}, {pipeline_mode = #tpu.pipeline_mode<synchronous>, transform_indices = @transform_11, window_bounds = array<i64: 9, 64, 16>}, {pipeline_mode = #tpu.pipeline_mode<synchronous>, transform_indices = @transform_12, window_bounds = array<i64: 16, 64>}, {pipeline_mode = #tpu.pipeline_mode<synchronous>, transform_indices = @transform_13, window_bounds = array<i64: 16, 72>}, {pipeline_mode = #tpu.pipeline_mode<synchronous>, transform_indices = @transform_14, window_bounds = array<i64: 16, 144>}, {transform_indices = @transform_15, window_bounds = array<i64: 1, 16, 128>}, {transform_indices = @transform_16, window_bounds = array<i64: 1, 16, 128>}]} {
    %c0 = arith.constant 0 : index
    %c0_0 = arith.constant 0 : index
    %0 = vector.load %arg11[%c0, %c0_0] : memref<16x128xf32, #tpu.memory_space<vmem>>, vector<16x128xf32>
    %c0_1 = arith.constant 0 : index
    %c0_2 = arith.constant 0 : index
    %c0_3 = arith.constant 0 : index
    %1 = vector.load %arg1[%c0_1, %c0_2, %c0_3] : memref<1x64x256xbf16, #tpu.memory_space<vmem>>, vector<1x64x256xbf16>
    %2 = vector.shape_cast %1 : vector<1x64x256xbf16> to vector<64x256xbf16>
    %c0_4 = arith.constant 0 : index
    %c0_5 = arith.constant 0 : index
    %3 = vector.load %arg2[%c0_4, %c0_5] : memref<256x16xbf16, #tpu.memory_space<vmem>>, vector<256x16xbf16>
    %cst = arith.constant dense<0.000000e+00> : vector<64x16xf32>
    %4 = tpu.matmul %2, %3, %cst {dimension_numbers = #tpu.dot_dimension_numbers<[1], [0], [0], [1], [0, 0, 1, 1], [], []>} : vector<64x256xbf16>, vector<256x16xbf16>, vector<64x16xf32> -> vector<64x16xf32>
    %5 = vector.extract_strided_slice %0 {offsets = [0, 0], sizes = [1, 16], strides = [1, 1]} : vector<16x128xf32> to vector<1x16xf32>
    %6 = vector.broadcast %5 : vector<1x16xf32> to vector<64x16xf32>
    %7 = arith.addf %4, %6 : vector<64x16xf32>
    %cst_6 = arith.constant 0.000000e+00 : f32
    %8 = vector.broadcast %cst_6 : f32 to vector<64x16xf32>
    %9 = arith.maximumf %7, %8 : vector<64x16xf32>
    %c9_i32 = arith.constant 9 : i32
    %10 = tpu.dynamic_rotate %9 by %c9_i32 dim 0 : vector<64x16xf32>, i32 -> vector<64x16xf32>
    %c0_7 = arith.constant 0 : index
    %c0_8 = arith.constant 0 : index
    %c0_9 = arith.constant 0 : index
    %11 = vector.load %arg12[%c0_7, %c0_8, %c0_9] : memref<9x64x16xf32, #tpu.memory_space<vmem>>, vector<1x64x16xf32>
    %12 = vector.shape_cast %11 : vector<1x64x16xf32> to vector<64x16xf32>
    %13 = arith.mulf %10, %12 : vector<64x16xf32>
    %14 = arith.maximumf %9, %13 : vector<64x16xf32>
    %c8_i32 = arith.constant 8 : i32
    %15 = tpu.dynamic_rotate %9 by %c8_i32 dim 0 : vector<64x16xf32>, i32 -> vector<64x16xf32>
    %c1 = arith.constant 1 : index
    %c0_10 = arith.constant 0 : index
    %c0_11 = arith.constant 0 : index
    %16 = vector.load %arg12[%c1, %c0_10, %c0_11] : memref<9x64x16xf32, #tpu.memory_space<vmem>>, vector<1x64x16xf32>
    %17 = vector.shape_cast %16 : vector<1x64x16xf32> to vector<64x16xf32>
    %18 = arith.mulf %15, %17 : vector<64x16xf32>
    %19 = arith.maximumf %14, %18 : vector<64x16xf32>
    %c7_i32 = arith.constant 7 : i32
    %20 = tpu.dynamic_rotate %9 by %c7_i32 dim 0 : vector<64x16xf32>, i32 -> vector<64x16xf32>
    %c2 = arith.constant 2 : index
    %c0_12 = arith.constant 0 : index
    %c0_13 = arith.constant 0 : index
    %21 = vector.load %arg12[%c2, %c0_12, %c0_13] : memref<9x64x16xf32, #tpu.memory_space<vmem>>, vector<1x64x16xf32>
    %22 = vector.shape_cast %21 : vector<1x64x16xf32> to vector<64x16xf32>
    %23 = arith.mulf %20, %22 : vector<64x16xf32>
    %24 = arith.maximumf %19, %23 : vector<64x16xf32>
    %c1_i32 = arith.constant 1 : i32
    %25 = tpu.dynamic_rotate %9 by %c1_i32 dim 0 : vector<64x16xf32>, i32 -> vector<64x16xf32>
    %c3 = arith.constant 3 : index
    %c0_14 = arith.constant 0 : index
    %c0_15 = arith.constant 0 : index
    %26 = vector.load %arg12[%c3, %c0_14, %c0_15] : memref<9x64x16xf32, #tpu.memory_space<vmem>>, vector<1x64x16xf32>
    %27 = vector.shape_cast %26 : vector<1x64x16xf32> to vector<64x16xf32>
    %28 = arith.mulf %25, %27 : vector<64x16xf32>
    %29 = arith.maximumf %24, %28 : vector<64x16xf32>
    %c63_i32 = arith.constant 63 : i32
    %30 = tpu.dynamic_rotate %9 by %c63_i32 dim 0 : vector<64x16xf32>, i32 -> vector<64x16xf32>
    %c5 = arith.constant 5 : index
    %c0_16 = arith.constant 0 : index
    %c0_17 = arith.constant 0 : index
    %31 = vector.load %arg12[%c5, %c0_16, %c0_17] : memref<9x64x16xf32, #tpu.memory_space<vmem>>, vector<1x64x16xf32>
    %32 = vector.shape_cast %31 : vector<1x64x16xf32> to vector<64x16xf32>
    %33 = arith.mulf %30, %32 : vector<64x16xf32>
    %34 = arith.maximumf %29, %33 : vector<64x16xf32>
    %c57_i32 = arith.constant 57 : i32
    %35 = tpu.dynamic_rotate %9 by %c57_i32 dim 0 : vector<64x16xf32>, i32 -> vector<64x16xf32>
    %c6 = arith.constant 6 : index
    %c0_18 = arith.constant 0 : index
    %c0_19 = arith.constant 0 : index
    %36 = vector.load %arg12[%c6, %c0_18, %c0_19] : memref<9x64x16xf32, #tpu.memory_space<vmem>>, vector<1x64x16xf32>
    %37 = vector.shape_cast %36 : vector<1x64x16xf32> to vector<64x16xf32>
    %38 = arith.mulf %35, %37 : vector<64x16xf32>
    %39 = arith.maximumf %34, %38 : vector<64x16xf32>
    %c56_i32 = arith.constant 56 : i32
    %40 = tpu.dynamic_rotate %9 by %c56_i32 dim 0 : vector<64x16xf32>, i32 -> vector<64x16xf32>
    %c7 = arith.constant 7 : index
    %c0_20 = arith.constant 0 : index
    %c0_21 = arith.constant 0 : index
    %41 = vector.load %arg12[%c7, %c0_20, %c0_21] : memref<9x64x16xf32, #tpu.memory_space<vmem>>, vector<1x64x16xf32>
    %42 = vector.shape_cast %41 : vector<1x64x16xf32> to vector<64x16xf32>
    %43 = arith.mulf %40, %42 : vector<64x16xf32>
    %44 = arith.maximumf %39, %43 : vector<64x16xf32>
    %c55_i32 = arith.constant 55 : i32
    %45 = tpu.dynamic_rotate %9 by %c55_i32 dim 0 : vector<64x16xf32>, i32 -> vector<64x16xf32>
    %c8 = arith.constant 8 : index
    %c0_22 = arith.constant 0 : index
    %c0_23 = arith.constant 0 : index
    %46 = vector.load %arg12[%c8, %c0_22, %c0_23] : memref<9x64x16xf32, #tpu.memory_space<vmem>>, vector<1x64x16xf32>
    %47 = vector.shape_cast %46 : vector<1x64x16xf32> to vector<64x16xf32>
    %48 = arith.mulf %45, %47 : vector<64x16xf32>
    %49 = arith.maximumf %44, %48 : vector<64x16xf32>
    %c0_24 = arith.constant 0 : index
    %c0_25 = arith.constant 0 : index
    %50 = vector.load %arg13[%c0_24, %c0_25] : memref<16x64xbf16, #tpu.memory_space<vmem>>, vector<16x64xbf16>
    %51 = arith.truncf %49 : vector<64x16xf32> to vector<64x16xbf16>
    %cst_26 = arith.constant dense<0.000000e+00> : vector<16x16xf32>
    %52 = tpu.matmul %50, %51, %cst_26 {dimension_numbers = #tpu.dot_dimension_numbers<[1], [0], [0], [1], [0, 0, 1, 1], [], []>} : vector<16x64xbf16>, vector<64x16xbf16>, vector<16x16xf32> -> vector<16x16xf32>
    %c0_27 = arith.constant 0 : index
    %c0_28 = arith.constant 0 : index
    %53 = vector.load %arg3[%c0_27, %c0_28] : memref<16x128xbf16, #tpu.memory_space<vmem>>, vector<16x128xbf16>
    %54 = arith.truncf %52 : vector<16x16xf32> to vector<16x16xbf16>
    %cst_29 = arith.constant dense<0.000000e+00> : vector<16x128xf32>
    %55 = tpu.matmul %54, %53, %cst_29 {dimension_numbers = #tpu.dot_dimension_numbers<[1], [0], [0], [1], [0, 0, 1, 1], [], []>} : vector<16x16xbf16>, vector<16x128xbf16>, vector<16x128xf32> -> vector<16x128xf32>
    %56 = vector.extract_strided_slice %0 {offsets = [1, 0], sizes = [1, 128], strides = [1, 1]} : vector<16x128xf32> to vector<1x128xf32>
    %57 = vector.broadcast %56 : vector<1x128xf32> to vector<16x128xf32>
    %58 = arith.addf %55, %57 : vector<16x128xf32>
    %c0_30 = arith.constant 0 : index
    %c0_31 = arith.constant 0 : index
    %59 = vector.load %arg4[%c0_30, %c0_31] : memref<16x8xbf16, #tpu.memory_space<vmem>>, vector<16x8xbf16>
    %60 = arith.truncf %52 : vector<16x16xf32> to vector<16x16xbf16>
    %cst_32 = arith.constant dense<0.000000e+00> : vector<16x8xf32>
    %61 = tpu.matmul %60, %59, %cst_32 {dimension_numbers = #tpu.dot_dimension_numbers<[1], [0], [0], [1], [0, 0, 1, 1], [], []>} : vector<16x16xbf16>, vector<16x8xbf16>, vector<16x8xf32> -> vector<16x8xf32>
    %62 = vector.extract_strided_slice %0 {offsets = [2, 0], sizes = [1, 8], strides = [1, 1]} : vector<16x128xf32> to vector<1x8xf32>
    %63 = vector.broadcast %62 : vector<1x8xf32> to vector<16x8xf32>
    %64 = arith.addf %61, %63 : vector<16x8xf32>
    %cst_33 = arith.constant 0.000000e+00 : f32
    %65 = vector.broadcast %cst_33 : f32 to vector<16x8xf32>
    %66 = arith.maximumf %64, %65 : vector<16x8xf32>
    %c5_i32 = arith.constant 5 : i32
    %67 = tpu.dynamic_rotate %66 by %c5_i32 dim 0 : vector<16x8xf32>, i32 -> vector<16x8xf32>
    %c4_i32 = arith.constant 4 : i32
    %68 = tpu.dynamic_rotate %66 by %c4_i32 dim 0 : vector<16x8xf32>, i32 -> vector<16x8xf32>
    %c3_i32 = arith.constant 3 : i32
    %69 = tpu.dynamic_rotate %66 by %c3_i32 dim 0 : vector<16x8xf32>, i32 -> vector<16x8xf32>
    %c1_i32_34 = arith.constant 1 : i32
    %70 = tpu.dynamic_rotate %66 by %c1_i32_34 dim 0 : vector<16x8xf32>, i32 -> vector<16x8xf32>
    %c15_i32 = arith.constant 15 : i32
    %71 = tpu.dynamic_rotate %66 by %c15_i32 dim 0 : vector<16x8xf32>, i32 -> vector<16x8xf32>
    %c13_i32 = arith.constant 13 : i32
    %72 = tpu.dynamic_rotate %66 by %c13_i32 dim 0 : vector<16x8xf32>, i32 -> vector<16x8xf32>
    %c12_i32 = arith.constant 12 : i32
    %73 = tpu.dynamic_rotate %66 by %c12_i32 dim 0 : vector<16x8xf32>, i32 -> vector<16x8xf32>
    %c11_i32 = arith.constant 11 : i32
    %74 = tpu.dynamic_rotate %66 by %c11_i32 dim 0 : vector<16x8xf32>, i32 -> vector<16x8xf32>
    %75 = tpu.concatenate %67, %68, %69, %70, %66, %71, %72, %73, %74 in 1 : vector<16x8xf32>, vector<16x8xf32>, vector<16x8xf32>, vector<16x8xf32>, vector<16x8xf32>, vector<16x8xf32>, vector<16x8xf32>, vector<16x8xf32>, vector<16x8xf32> -> vector<16x72xf32>
    %c0_35 = arith.constant 0 : index
    %c0_36 = arith.constant 0 : index
    %76 = vector.load %arg14[%c0_35, %c0_36] : memref<16x72xf32, #tpu.memory_space<vmem>>, vector<16x72xf32>
    %77 = arith.mulf %75, %76 : vector<16x72xf32>
    %c0_37 = arith.constant 0 : index
    %c0_38 = arith.constant 0 : index
    %78 = vector.load %arg5[%c0_37, %c0_38] : memref<72x8xbf16, #tpu.memory_space<vmem>>, vector<72x8xbf16>
    %79 = arith.truncf %77 : vector<16x72xf32> to vector<16x72xbf16>
    %cst_39 = arith.constant dense<0.000000e+00> : vector<16x8xf32>
    %80 = tpu.matmul %79, %78, %cst_39 {dimension_numbers = #tpu.dot_dimension_numbers<[1], [0], [0], [1], [0, 0, 1, 1], [], []>} : vector<16x72xbf16>, vector<72x8xbf16>, vector<16x8xf32> -> vector<16x8xf32>
    %81 = vector.extract_strided_slice %0 {offsets = [3, 0], sizes = [1, 8], strides = [1, 1]} : vector<16x128xf32> to vector<1x8xf32>
    %82 = vector.broadcast %81 : vector<1x8xf32> to vector<16x8xf32>
    %83 = arith.addf %80, %82 : vector<16x8xf32>
    %cst_40 = arith.constant 0.000000e+00 : f32
    %84 = vector.broadcast %cst_40 : f32 to vector<16x8xf32>
    %85 = arith.maximumf %83, %84 : vector<16x8xf32>
    %c0_41 = arith.constant 0 : index
    %c0_42 = arith.constant 0 : index
    %86 = vector.load %arg6[%c0_41, %c0_42] : memref<8x128xbf16, #tpu.memory_space<vmem>>, vector<8x128xbf16>
    %87 = arith.truncf %85 : vector<16x8xf32> to vector<16x8xbf16>
    %cst_43 = arith.constant dense<0.000000e+00> : vector<16x128xf32>
    %88 = tpu.matmul %87, %86, %cst_43 {dimension_numbers = #tpu.dot_dimension_numbers<[1], [0], [0], [1], [0, 0, 1, 1], [], []>} : vector<16x8xbf16>, vector<8x128xbf16>, vector<16x128xf32> -> vector<16x128xf32>
    %89 = vector.extract_strided_slice %0 {offsets = [4, 0], sizes = [1, 128], strides = [1, 1]} : vector<16x128xf32> to vector<1x128xf32>
    %90 = vector.broadcast %89 : vector<1x128xf32> to vector<16x128xf32>
    %91 = arith.addf %88, %90 : vector<16x128xf32>
    %92 = arith.addf %91, %58 : vector<16x128xf32>
    %cst_44 = arith.constant 0.000000e+00 : f32
    %93 = vector.broadcast %cst_44 : f32 to vector<16x128xf32>
    %94 = arith.maximumf %92, %93 : vector<16x128xf32>
    %c0_45 = arith.constant 0 : index
    %c0_46 = arith.constant 0 : index
    %c0_47 = arith.constant 0 : index
    %95 = vector.load %arg16[%c0_45, %c0_46, %c0_47] : memref<1x16x128xf32, #tpu.memory_space<vmem>>, vector<1x16x128xf32>
    %96 = vector.shape_cast %95 : vector<1x16x128xf32> to vector<16x128xf32>
    %97 = vector.shape_cast %94 : vector<16x128xf32> to vector<1x16x128xf32>
    tpu.vector_store %arg16[%c0_45, %c0_46, %c0_47], %97 {strides = array<i32>} : memref<1x16x128xf32, #tpu.memory_space<vmem>>, vector<1x16x128xf32>,
    %98 = vector.extract_strided_slice %94 {offsets = [0, 0], sizes = [16, 32], strides = [1, 1]} : vector<16x128xf32> to vector<16x32xf32>
    %c0_48 = arith.constant 0 : index
    %c0_49 = arith.constant 0 : index
    %99 = vector.load %arg7[%c0_48, %c0_49] : memref<32x128xbf16, #tpu.memory_space<vmem>>, vector<32x128xbf16>
    %100 = arith.truncf %98 : vector<16x32xf32> to vector<16x32xbf16>
    %cst_50 = arith.constant dense<0.000000e+00> : vector<16x128xf32>
    %101 = tpu.matmul %100, %99, %cst_50 {dimension_numbers = #tpu.dot_dimension_numbers<[1], [0], [0], [1], [0, 0, 1, 1], [], []>} : vector<16x32xbf16>, vector<32x128xbf16>, vector<16x128xf32> -> vector<16x128xf32>
    %102 = vector.extract_strided_slice %0 {offsets = [5, 0], sizes = [1, 128], strides = [1, 1]} : vector<16x128xf32> to vector<1x128xf32>
    %103 = vector.broadcast %102 : vector<1x128xf32> to vector<16x128xf32>
    %104 = arith.addf %101, %103 : vector<16x128xf32>
    %c0_51 = arith.constant 0 : index
    %c0_52 = arith.constant 0 : index
    %105 = vector.load %arg8[%c0_51, %c0_52] : memref<32x16xbf16, #tpu.memory_space<vmem>>, vector<32x16xbf16>
    %106 = arith.truncf %98 : vector<16x32xf32> to vector<16x32xbf16>
    %cst_53 = arith.constant dense<0.000000e+00> : vector<16x16xf32>
    %107 = tpu.matmul %106, %105, %cst_53 {dimension_numbers = #tpu.dot_dimension_numbers<[1], [0], [0], [1], [0, 0, 1, 1], [], []>} : vector<16x32xbf16>, vector<32x16xbf16>, vector<16x16xf32> -> vector<16x16xf32>
    %108 = vector.extract_strided_slice %0 {offsets = [6, 0], sizes = [1, 16], strides = [1, 1]} : vector<16x128xf32> to vector<1x16xf32>
    %109 = vector.broadcast %108 : vector<1x16xf32> to vector<16x16xf32>
    %110 = arith.addf %107, %109 : vector<16x16xf32>
    %cst_54 = arith.constant 0.000000e+00 : f32
    %111 = vector.broadcast %cst_54 : f32 to vector<16x16xf32>
    %112 = arith.maximumf %110, %111 : vector<16x16xf32>
    %c10_i32 = arith.constant 10 : i32
    %113 = tpu.dynamic_rotate %112 by %c10_i32 dim 0 : vector<16x16xf32>, i32 -> vector<16x16xf32>
    %c8_i32_55 = arith.constant 8 : i32
    %114 = tpu.dynamic_rotate %112 by %c8_i32_55 dim 0 : vector<16x16xf32>, i32 -> vector<16x16xf32>
    %c6_i32 = arith.constant 6 : i32
    %115 = tpu.dynamic_rotate %112 by %c6_i32 dim 0 : vector<16x16xf32>, i32 -> vector<16x16xf32>
    %c2_i32 = arith.constant 2 : i32
    %116 = tpu.dynamic_rotate %112 by %c2_i32 dim 0 : vector<16x16xf32>, i32 -> vector<16x16xf32>
    %c14_i32 = arith.constant 14 : i32
    %117 = tpu.dynamic_rotate %112 by %c14_i32 dim 0 : vector<16x16xf32>, i32 -> vector<16x16xf32>
    %c10_i32_56 = arith.constant 10 : i32
    %118 = tpu.dynamic_rotate %112 by %c10_i32_56 dim 0 : vector<16x16xf32>, i32 -> vector<16x16xf32>
    %c8_i32_57 = arith.constant 8 : i32
    %119 = tpu.dynamic_rotate %112 by %c8_i32_57 dim 0 : vector<16x16xf32>, i32 -> vector<16x16xf32>
    %c6_i32_58 = arith.constant 6 : i32
    %120 = tpu.dynamic_rotate %112 by %c6_i32_58 dim 0 : vector<16x16xf32>, i32 -> vector<16x16xf32>
    %121 = tpu.concatenate %113, %114, %115, %116, %112, %117, %118, %119, %120 in 1 : vector<16x16xf32>, vector<16x16xf32>, vector<16x16xf32>, vector<16x16xf32>, vector<16x16xf32>, vector<16x16xf32>, vector<16x16xf32>, vector<16x16xf32>, vector<16x16xf32> -> vector<16x144xf32>
    %c0_59 = arith.constant 0 : index
    %c0_60 = arith.constant 0 : index
    %122 = vector.load %arg15[%c0_59, %c0_60] : memref<16x144xf32, #tpu.memory_space<vmem>>, vector<16x144xf32>
    %123 = arith.mulf %121, %122 : vector<16x144xf32>
    %c0_61 = arith.constant 0 : index
    %c0_62 = arith.constant 0 : index
    %124 = vector.load %arg9[%c0_61, %c0_62] : memref<144x16xbf16, #tpu.memory_space<vmem>>, vector<144x16xbf16>
    %125 = arith.truncf %123 : vector<16x144xf32> to vector<16x144xbf16>
    %cst_63 = arith.constant dense<0.000000e+00> : vector<16x16xf32>
    %126 = tpu.matmul %125, %124, %cst_63 {dimension_numbers = #tpu.dot_dimension_numbers<[1], [0], [0], [1], [0, 0, 1, 1], [], []>} : vector<16x144xbf16>, vector<144x16xbf16>, vector<16x16xf32> -> vector<16x16xf32>
    %127 = vector.extract_strided_slice %0 {offsets = [7, 0], sizes = [1, 16], strides = [1, 1]} : vector<16x128xf32> to vector<1x16xf32>
    %128 = vector.broadcast %127 : vector<1x16xf32> to vector<16x16xf32>
    %129 = arith.addf %126, %128 : vector<16x16xf32>
    %cst_64 = arith.constant 0.000000e+00 : f32
    %130 = vector.broadcast %cst_64 : f32 to vector<16x16xf32>
    %131 = arith.maximumf %129, %130 : vector<16x16xf32>
    %c0_65 = arith.constant 0 : index
    %c0_66 = arith.constant 0 : index
    %132 = vector.load %arg10[%c0_65, %c0_66] : memref<16x128xbf16, #tpu.memory_space<vmem>>, vector<16x128xbf16>
    %133 = arith.truncf %131 : vector<16x16xf32> to vector<16x16xbf16>
    %cst_67 = arith.constant dense<0.000000e+00> : vector<16x128xf32>
    %134 = tpu.matmul %133, %132, %cst_67 {dimension_numbers = #tpu.dot_dimension_numbers<[1], [0], [0], [1], [0, 0, 1, 1], [], []>} : vector<16x16xbf16>, vector<16x128xbf16>, vector<16x128xf32> -> vector<16x128xf32>
    %135 = vector.extract_strided_slice %0 {offsets = [8, 0], sizes = [1, 128], strides = [1, 1]} : vector<16x128xf32> to vector<1x128xf32>
    %136 = vector.broadcast %135 : vector<1x128xf32> to vector<16x128xf32>
    %137 = arith.addf %134, %136 : vector<16x128xf32>
    %138 = arith.addf %137, %104 : vector<16x128xf32>
    %cst_68 = arith.constant 0.000000e+00 : f32
    %139 = vector.broadcast %cst_68 : f32 to vector<16x128xf32>
    %140 = arith.maximumf %138, %139 : vector<16x128xf32>
    %c0_69 = arith.constant 0 : index
    %c0_70 = arith.constant 0 : index
    %c0_71 = arith.constant 0 : index
    %141 = vector.load %arg17[%c0_69, %c0_70, %c0_71] : memref<1x16x128xf32, #tpu.memory_space<vmem>>, vector<1x16x128xf32>
    %142 = vector.shape_cast %141 : vector<1x16x128xf32> to vector<16x128xf32>
    %143 = vector.shape_cast %140 : vector<16x128xf32> to vector<1x16x128xf32>
    tpu.vector_store %arg17[%c0_69, %c0_70, %c0_71], %143 {strides = array<i32>} : memref<1x16x128xf32, #tpu.memory_space<vmem>>, vector<1x16x128xf32>,
    return
  }
  func.func @transform_0(%arg0: i32) -> (i32, i32, i32) {
    %c0_i32 = arith.constant 0 : i32
    %c0_i32_0 = arith.constant 0 : i32
    %c0_i32_1 = arith.constant 0 : i32
    return %arg0, %c0_i32, %c0_i32_0 : i32, i32, i32
  }
  func.func @transform_1(%arg0: i32) -> (i32, i32) {
    %c0_i32 = arith.constant 0 : i32
    %c0_i32_0 = arith.constant 0 : i32
    %c0_i32_1 = arith.constant 0 : i32
    return %c0_i32, %c0_i32_0 : i32, i32
  }
  func.func @transform_2(%arg0: i32) -> (i32, i32) {
    %c0_i32 = arith.constant 0 : i32
    %c0_i32_0 = arith.constant 0 : i32
    %c0_i32_1 = arith.constant 0 : i32
    return %c0_i32, %c0_i32_0 : i32, i32
  }
  func.func @transform_3(%arg0: i32) -> (i32, i32) {
    %c0_i32 = arith.constant 0 : i32
    %c0_i32_0 = arith.constant 0 : i32
    %c0_i32_1 = arith.constant 0 : i32
    return %c0_i32, %c0_i32_0 : i32, i32
  }
  func.func @transform_4(%arg0: i32) -> (i32, i32) {
    %c0_i32 = arith.constant 0 : i32
    %c0_i32_0 = arith.constant 0 : i32
    %c0_i32_1 = arith.constant 0 : i32
    return %c0_i32, %c0_i32_0 : i32, i32
  }
  func.func @transform_5(%arg0: i32) -> (i32, i32) {
    %c0_i32 = arith.constant 0 : i32
    %c0_i32_0 = arith.constant 0 : i32
    %c0_i32_1 = arith.constant 0 : i32
    return %c0_i32, %c0_i32_0 : i32, i32
  }
  func.func @transform_6(%arg0: i32) -> (i32, i32) {
    %c0_i32 = arith.constant 0 : i32
    %c0_i32_0 = arith.constant 0 : i32
    %c0_i32_1 = arith.constant 0 : i32
    return %c0_i32, %c0_i32_0 : i32, i32
  }
  func.func @transform_7(%arg0: i32) -> (i32, i32) {
    %c0_i32 = arith.constant 0 : i32
    %c0_i32_0 = arith.constant 0 : i32
    %c0_i32_1 = arith.constant 0 : i32
    return %c0_i32, %c0_i32_0 : i32, i32
  }
  func.func @transform_8(%arg0: i32) -> (i32, i32) {
    %c0_i32 = arith.constant 0 : i32
    %c0_i32_0 = arith.constant 0 : i32
    %c0_i32_1 = arith.constant 0 : i32
    return %c0_i32, %c0_i32_0 : i32, i32
  }
  func.func @transform_9(%arg0: i32) -> (i32, i32) {
    %c0_i32 = arith.constant 0 : i32
    %c0_i32_0 = arith.constant 0 : i32
    %c0_i32_1 = arith.constant 0 : i32
    return %c0_i32, %c0_i32_0 : i32, i32
  }
  func.func @transform_10(%arg0: i32) -> (i32, i32) {
    %c0_i32 = arith.constant 0 : i32
    %c0_i32_0 = arith.constant 0 : i32
    %c0_i32_1 = arith.constant 0 : i32
    return %c0_i32, %c0_i32_0 : i32, i32
  }
  func.func @transform_11(%arg0: i32) -> (i32, i32, i32) {
    %c0_i32 = arith.constant 0 : i32
    %c0_i32_0 = arith.constant 0 : i32
    %c0_i32_1 = arith.constant 0 : i32
    %c0_i32_2 = arith.constant 0 : i32
    return %c0_i32, %c0_i32_0, %c0_i32_1 : i32, i32, i32
  }
  func.func @transform_12(%arg0: i32) -> (i32, i32) {
    %c0_i32 = arith.constant 0 : i32
    %c0_i32_0 = arith.constant 0 : i32
    %c0_i32_1 = arith.constant 0 : i32
    return %c0_i32, %c0_i32_0 : i32, i32
  }
  func.func @transform_13(%arg0: i32) -> (i32, i32) {
    %c0_i32 = arith.constant 0 : i32
    %c0_i32_0 = arith.constant 0 : i32
    %c0_i32_1 = arith.constant 0 : i32
    return %c0_i32, %c0_i32_0 : i32, i32
  }
  func.func @transform_14(%arg0: i32) -> (i32, i32) {
    %c0_i32 = arith.constant 0 : i32
    %c0_i32_0 = arith.constant 0 : i32
    %c0_i32_1 = arith.constant 0 : i32
    return %c0_i32, %c0_i32_0 : i32, i32
  }
  func.func @transform_15(%arg0: i32) -> (i32, i32, i32) {
    %c0_i32 = arith.constant 0 : i32
    %c0_i32_0 = arith.constant 0 : i32
    %c0_i32_1 = arith.constant 0 : i32
    return %arg0, %c0_i32, %c0_i32_0 : i32, i32, i32
  }
  func.func @transform_16(%arg0: i32) -> (i32, i32, i32) {
    %c0_i32 = arith.constant 0 : i32
    %c0_i32_0 = arith.constant 0 : i32
    %c0_i32_1 = arith.constant 0 : i32
    return %arg0, %c0_i32, %c0_i32_0 : i32, i32, i32
  }
}

</mosaic_0001>

<bundles_post_ra>
// kernel: seg_feature_extractor.1
= control target key start
LH: loop header
LB: loop body
LE: loop exit
PB: predicated region body
PF: predicated region fallthrough
CT: control target
= control target key end

     0   :  { %s3420_s0 = inlined_call_operand.vmem [shape: bf16[2,64,256], index: 0, kind: input, shape index: {}]   ;;  %s3421_s1 = inlined_call_operand.vmem [shape: bf16[256,16], index: 1, kind: input, shape index: {}]   ;;  %s3422_s2 = inlined_call_operand.vmem [shape: bf16[16,128], index: 2, kind: input, shape index: {}]   ;;  %s3423_s3 = inlined_call_operand.vmem [shape: bf16[16,8], index: 3, kind: input, shape index: {}]   ;;  %s3424_s4 = inlined_call_operand.vmem [shape: bf16[72,8], index: 4, kind: input, shape index: {}]   ;;  %s3425_s5 = inlined_call_operand.vmem [shape: bf16[8,128], index: 5, kind: input, shape index: {}]   ;;  %s3426_s6 = inlined_call_operand.vmem [shape: bf16[32,128], index: 6, kind: input, shape index: {}]   ;;  %s3427_s7 = inlined_call_operand.vmem [shape: bf16[32,16], index: 7, kind: input, shape index: {}]   ;;  %s3428_s8 = inlined_call_operand.vmem [shape: bf16[144,16], index: 8, kind: input, shape index: {}]   ;;  %s3429_s9 = inlined_call_operand.vmem [shape: bf16[16,128], index: 9, kind: input, shape index: {}]   ;;  %s3430_s10 = inlined_call_operand.vmem [shape: f32[16,128], index: 10, kind: input, shape index: {}]   ;;  %s3431_s11 = inlined_call_operand.vmem [shape: f32[9,64,16], index: 11, kind: input, shape index: {}]   ;;  %s3432_s12 = inlined_call_operand.vmem [shape: bf16[16,64], index: 12, kind: input, shape index: {}]   ;;  %s3433_s13 = inlined_call_operand.vmem [shape: f32[16,72], index: 13, kind: input, shape index: {}]   ;;  %s3434_s14 = inlined_call_operand.vmem [shape: f32[16,144], index: 14, kind: input, shape index: {}]   ;;  %s3435_s15 = inlined_call_operand.hbm [shape: f32[2,16,128], index: 15, kind: output, shape index: {0}]   ;;  %s3436_s16 = inlined_call_operand.hbm [shape: f32[2,16,128], index: 16, kind: output, shape index: {1}]  }
   0x1   :  { %3448 = sst [smem:[#allocation14_spill]] %s3420_s0 }
   0x2   :  { %3449 = sst [smem:[#allocation15_spill]] %s3421_s1 }
   0x3   :  { %22 = vsyncpa [#allocation3], 0 }
   0x4   :  { %24 = vsyncpa [#allocation3 + $0x1], 0 }
   0x5   :  { %25 = vsyncpa [#allocation5], 0 }
   0x6   :  { %27 = vsyncpa [#allocation5 + $0x1], 0  ;;  %s2561_s21 = smov 0   ;;  %s2563_s22 = smov 0  }
   0x7   :  { %s2565_s23 = smov 0   ;;  %s2567_s24 = smov 0  }
   0x8 LB: > { %3450 = sst [smem:[#allocation8_spill]] %s2445_s21  ;;  %s2582_s25 = sadd.s32 4294967295, %s2457_s24   ;;  %s2457_s24 = sphi %s2567_s24, %s3467_s24   ;;  %s2453_s23 = sphi %s2565_s23, %s3469_s23   ;;  %s2449_s22 = sphi %s2563_s22, %s3471_s22   ;;  %s2445_s21 = sphi %s2561_s21, %s3470_s21  }
   0x9   : > { %3451 = sst [smem:[#allocation9_spill]] %s2453_s23  ;;  %s1978_s26 = sadd.s32 4294967294, %s2457_s24  }
   0xa   : > { %3452 = sst [smem:[#allocation10_spill]] %s2457_s24  ;;  %s2586_s27 = sadd.s32 1, %s2457_s24  }
   0xb   : > { %3453 = sst [smem:[#allocation11_spill]] %s2586_s27  ;;  %s360_s28 = sadd.s32 1, %s2453_s23 }
   0xc   : > { %s357_s29 = ssub.s32 %s2457_s24, %s2586_s27  ;;  %p370_p0 = scmp.ne.s32.totalorder %s2453_s23, %s2449_s22 }
   0xd   : > { %p358_p1 = scmp.eq.s32.totalorder %s357_s29, 0  ;;  %p371_p2 = scmp.eq.s32.totalorder %s2582_s25, 1 }
   0xe   : > { %p376_p3 = scmp.ne.s32.totalorder %s2449_s22, %s2445_s21  ;;  %p377_p4 = scmp.eq.s32.totalorder %s1978_s26, 1 }
   0xf   : > { %s2597_s30 = scalar_select %p358_p1, %s2453_s23, %s360_s28  }
  0x10   : > { %p2599_p5 = por %p371_p2, %p370_p0  ;;  %p2603_p6 = por %p377_p4, %p376_p3 }
  0x11   : > { %3454 = sst [smem:[#allocation12_spill]] %s2597_s30  ;;  %p1981_p7 = scmp.ge.s32.totalorder %s2457_s24, 1 }
  0x12   : > { %s3456_s17 = scalar_select %p2603_p6, 1, 0 }
  0x13   : > { %p471_p8 = scmp.lt.s32.totalorder %s2457_s24, 3 }
  0x14   : > { %3457 = sst [smem:[#allocation13_spill]] %s3456_s17 }
  0x15   : > { %p472_p9 = pnand %p1981_p7, %p471_p8 }
  0x16   : > { %s3458_s1 = sld [smem:[#allocation15_spill]] (!%p472_p9)  ;;  %p526_p10 = scmp.lt.s32.totalorder (!%p472_p9), %s2582_s25, 1  ;;  %v2459_v24 = vmov (!%p472_p9), 0.0   ;;  %vm2460_vm0 = vmmov (!%p472_p9), 0   ;;  %v574_v25 = vlaneseq (!%p472_p9)  ;;  %v2681_v28 = vld [vmem:[%s3430_s10] sm:$0xff] (!%p472_p9)  ;;  %v808_v47 = vld [vmem:[%s3431_s11 + $0x10] sm:$0xff] (!%p472_p9) }
  0x17   : > { %475 = sbr.rel (%p472_p9) target bundleno = 2195 (0x893), region = 80  ;;  %s3459_s20 = sld [smem:[#allocation14_spill]] (!%p472_p9)  ;;  %2173 = vmatprep.subr.bf16.mxu1 (!%p472_p9), %v2459_v24  ;;  %2181 = vmatprep.mubr.msk.bf16.mxu1 (!%p472_p9), %vm2460_vm0, %v2459_v24  ;;  %v2011_v49 = vld [vmem:[%s3431_s11 + $0x48] sm:$0xff] (!%p472_p9)  ;;  %v2012_v51 = vld [vmem:[%s3431_s11 + $0x50] sm:$0xff] (!%p472_p9)  ;;  %v2050_v57 = vld [vmem:[%s3431_s11 + $0x1c0] sm:$0xff] (!%p472_p9)  ;;  %vm1033_vm3 = vcmask (!%p472_p9), 523264  }
  0x18   : > { %v2675_v26 = vshrl.u32 (!%p472_p9), %v574_v25, 7  ;;  %v2019_v56 = vld [vmem:[%s3431_s11 + $0x88] sm:$0xff] (!%p472_p9)  ;;  %v2013_v61 = vld [vmem:[%s3431_s11 + $0x58] sm:$0xff] (!%p472_p9)  ;;  %v2034_v63 = vld [vmem:[%s3431_s11 + $0x140] sm:$0xff] (!%p472_p9)  ;;  %vm1091_vm4 = vcmask (!%p472_p9), 130048   ;;  %s2461_s21 = smov (!%p472_p9), 32  }
  0x19   : > { %v2027_v59 = vld [vmem:[%s3431_s11 + $0xc8] sm:$0xff] (!%p472_p9)  ;;  %s3444_s27 = smov (!%p472_p9), 8   ;;  %s2463_s29 = smov (!%p472_p9), 16   ;;  %vm1345_vm8 = vcmask (!%p472_p9), 1043456   ;;  %vm1274_vm9 = vcmask (!%p472_p9), 64512   ;;  %vm1279_vm10 = vcmask (!%p472_p9), 195584  }
  0x1a   : > { %v576_v27 = vsub.s32 (!%p472_p9), 0, %v2675_v26  ;;  %vm797_vm1 = vcmp.lt.s32.totalorder (!%p472_p9), %v2675_v26, 1  ;;  %vm863_vm2 = vcmp.lt.s32.totalorder (!%p472_p9), %v2675_v26, 7  ;;  %v2035_v25 = vld [vmem:[%s3431_s11 + $0x148] sm:$0xff] (!%p472_p9)  ;;  %vm1198_vm5 = vcmp.lt.s32.totalorder (!%p472_p9), %v2675_v26, 4  ;;  %s2464_s30 = smov (!%p472_p9), 24  }
  0x1b   : > { %vm1203_vm6 = vcmp.lt.s32.totalorder (!%p472_p9), %v2675_v26, 3  ;;  %vm1193_vm7 = vcmp.lt.s32.totalorder (!%p472_p9), %v2675_v26, 5  ;;  %s2466_s28 = smov (!%p472_p9), 48   ;;  %s2467_s23 = smov (!%p472_p9), 56   ;;  %vm1282_vm11 = vcmask (!%p472_p9), 261120   ;;  %vm1285_vm12 = vcmask (!%p472_p9), 326656  }
  0x1c   : > { %v2312_v0 = vld [vmem:[%s3458_s1 + $0x40] sm:$0xff] (!%p472_p9)   ;;  %v2314_v2 = vld [vmem:[%s3458_s1 + $0x48] sm:$0xff] (!%p472_p9)   ;;  %v2316_v4 = vld [vmem:[%s3458_s1 + $0x50] sm:$0xff] (!%p472_p9)   ;;  %v2686_v30 = vrot.slane (!%p472_p9), %v2681_v28, %v576_v27  ;;  %vm1288_vm13 = vcmask (!%p472_p9), 392192   ;;  %vm1291_vm14 = vcmask (!%p472_p9), 457728   ;;  %vm1341_vm15 = vcmask (!%p472_p9), 588800  }
  0x1d   : > { %v2313_v1 = vld [vmem:[%s3458_s1] sm:$0xff] (!%p472_p9)   ;;  %2108 = vmatprep.subr.bf16.mxu0 (!%p472_p9), %v2312_v0  ;;  %v2315_v3 = vld [vmem:[%s3458_s1 + $0x8] sm:$0xff] (!%p472_p9)   ;;  %v2317_v5 = vld [vmem:[%s3458_s1 + $0x10] sm:$0xff] (!%p472_p9)  }
  0x1e   : > { %2109 = vmatpush3.bf16.msra.mxu0 %v2313_v1  ;;  %s527_s26 = scalar_select %p526_p10, %s2582_s25, 1  ;;  %v2318_v6 = vld [vmem:[%s3458_s1 + $0x58] sm:$0xff]   ;;  %v2320_v8 = vld [vmem:[%s3458_s1 + $0x60] sm:$0xff]   ;;  %v2322_v10 = vld [vmem:[%s3458_s1 + $0x68] sm:$0xff]  }
  0x1f   : > { %2110 = vmatprep.subr.bf16.mxu0 %v2314_v2  ;;  %v2319_v7 = vld [vmem:[%s3458_s1 + $0x18] sm:$0xff]   ;;  %v2321_v9 = vld [vmem:[%s3458_s1 + $0x20] sm:$0xff]   ;;  %v2323_v12 = vld [vmem:[%s3458_s1 + $0x28] sm:$0xff]  }
  0x20   : > { %s2105_s17 = sshll.u32 %s527_s26, 6  ;;  %v2324_v13 = vld [vmem:[%s3458_s1 + $0x70] sm:$0xff]   ;;  %v2326_v15 = vld [vmem:[%s3458_s1 + $0x78] sm:$0xff]   ;;  %v2042_v0 = vld [vmem:[%s3431_s11 + $0x180] sm:$0xff]  ;;  %s2468_s26 = smov 64  }
  0x21   : > { %s2641_s24 = scalar_lea.vmem %s3459_s20, %s2105_s17  ;;  %v2325_v14 = vld [vmem:[%s3458_s1 + $0x30] sm:$0xff]   ;;  %v2327_v16 = vld [vmem:[%s3458_s1 + $0x38] sm:$0xff]   ;;  %s2465_s17 = smov 40  }
  0x22   : > { %2111 = vmatpush3.bf16.msra.mxu0 %v2315_v3  ;;  %v2330_v11 = vld [vmem:[%s2641_s24 + $0x4] ss:$8 sps:$4 sm:$0xff]   ;;  %v2328_v17 = vld [vmem:[%s2641_s24] ss:$8 sps:$4 sm:$0xff]   ;;  %v2331_v18 = vld [vmem:[%s2641_s24 + $0x14] ss:$8 sps:$4 sm:$0xff]  }
  0x23   : > { %2112 = vmatprep.subr.bf16.mxu0 %v2316_v4  ;;  %746 = vmatprep.mubr.bf16.mxu0 %v2330_v11  ;;  %v2333_v19 = vld [vmem:[%s2641_s24 + $0x10] ss:$8 sps:$4 sm:$0xff]   ;;  %v2334_v20 = vld [vmem:[%s2641_s24 + $0x24] ss:$8 sps:$4 sm:$0xff]   ;;  %v2336_v21 = vld [vmem:[%s2641_s24 + $0x20] ss:$8 sps:$4 sm:$0xff]  }
  0x24   : > { %v2337_v22 = vld [vmem:[%s2641_s24 + $0x34] ss:$8 sps:$4 sm:$0xff]   ;;  %v2339_v23 = vld [vmem:[%s2641_s24 + $0x30] ss:$8 sps:$4 sm:$0xff]   ;;  %v2051_v4 = vld [vmem:[%s3431_s11 + $0x1c8] sm:$0xff] }
  0x26   : > { %2113 = vmatpush3.bf16.msra.mxu0 %v2317_v5 }
  0x27   : > { %2114 = vmatprep.subr.bf16.mxu0 %v2318_v6 }
  0x2a   : > { %2115 = vmatpush3.bf16.msra.mxu0 %v2319_v7 }
  0x2b   : > { %2116 = vmatprep.subr.bf16.mxu0 %v2320_v8 }
  0x2e   : > { %2117 = vmatpush3.bf16.msra.mxu0 %v2321_v9  ;;  %v809_v9 = vld [vmem:[%s3431_s11 + $0x18] sm:$0xff] }
  0x2f   : > { %2118 = vmatprep.subr.bf16.mxu0 %v2322_v10 }
  0x32   : > { %2119 = vmatpush3.bf16.msra.mxu0 %v2323_v12 }
  0x33   : > { %2120 = vmatprep.subr.bf16.mxu0 %v2324_v13  ;;  %v2014_v13 = vld [vmem:[%s3431_s11 + $0x60] sm:$0xff] }
  0x36   : > { %2121 = vmatpush3.bf16.msra.mxu0 %v2325_v14 }
  0x37   : > { %2122 = vmatprep.subr.bf16.mxu0 %v2326_v15 }
  0x3a   : > { %2123 = vmatpush3.bf16.msra.mxu0 %v2327_v16  ;;  %v2020_v16 = vld [vmem:[%s3431_s11 + $0x90] sm:$0xff] }
  0x3d   : > { %747 = vmatmul.mubr.bf16.vlgmr.msra.gmra.mrb[0].mxu0 %v2328_v17 }
  0x3e   : > { %754 = vmatprep.mubr.bf16.mxu0 %v2331_v18 }
  0x45   : > { %755 = vmatmul.mubr.bf16.gmra.mrb[4].mxu0 %v2333_v19 }
  0x46   : > { %762 = vmatprep.mubr.bf16.mxu0 %v2334_v20 }
  0x4d   : > { %763 = vmatmul.mubr.bf16.gmra.mrb[8].mxu0 %v2336_v21 }
  0x4e   : > { %770 = vmatprep.mubr.bf16.mxu0 %v2337_v22 }
  0x55   : > { %771 = vmatmul.mubr.bf16.gmra.mrb[12].mxu0 %v2339_v23  ;;  %v2028_v23 = vld [vmem:[%s3431_s11 + $0xd0] sm:$0xff] }
 0x110   : > { %v2124_v29 = vpop.f32.mrb[0].mxu0 }
 0x111   : > { %v2125_v31 = vpop.f32.mrb[1].mxu0 }
 0x112   : > { %v2126_v32 = vadd.f32 %v2125_v31, %v2124_v29  ;;  %v2127_v33 = vpop.f32.mrb[2].mxu0 }
 0x113   : > { %v2128_v34 = vpop.f32.mrb[3].mxu0 }
 0x114   : > { %v749_v35 = vadd.f32 %v2126_v32, %v2686_v30  ;;  %v2129_v36 = vadd.f32 %v2128_v34, %v2127_v33 }
 0x116   : > { %v2689_v37 = vmax.f32 %v749_v35, 0.0  ;;  %v752_v38 = vadd.f32 %v2129_v36, %v2686_v30  ;;  %v2043_v36 = vld [vmem:[%s3431_s11 + $0x188] sm:$0xff] }
 0x118   : > { %v2692_v39 = vmax.f32 %v752_v38, 0.0  ;;  %v2130_v40 = vpop.f32.mrb[4].mxu0  ;;  %v787_v41 = vrot.slane %v2689_v37, 7  ;;  %v855_v43 = vrot.slane %v2689_v37, 1  ;;  %v2742_v1 = vmul.f32 %v2011_v49, %v2689_v37 }
 0x119   : > { %v2131_v42 = vpop.f32.mrb[5].mxu0 }
 0x11a   : > { %v788_v44 = vrot.slane %v2692_v39, 7  ;;  %v2132_v45 = vadd.f32 %v2131_v42, %v2130_v40  ;;  %v2133_v46 = vpop.f32.mrb[6].mxu0  ;;  %v856_v48 = vrot.slane %v2692_v39, 1  ;;  %v841_v2 = vmul.f32 %v2012_v51, %v2692_v39 }
 0x11b   : > { %v2134_v50 = vpop.f32.mrb[7].mxu0  ;;  %v2752_v5 = vmul.f32 %v2050_v57, %v2692_v39 }
 0x11c   : > { %v757_v52 = vadd.f32 %v2132_v45, %v2686_v30  ;;  %v2135_v53 = vadd.f32 %v2134_v50, %v2133_v46  ;;  %v804_v54 = vsel %vm797_vm1, %v787_v41, %v788_v44  ;;  %v2718_v55 = vsel %vm863_vm2, %v855_v43, %v856_v48  ;;  %v2036_v46 = vld [vmem:[%s3431_s11 + $0x150] sm:$0xff] }
 0x11d   : > { %v816_v58 = vmul.f32 %v808_v47, %v804_v54  ;;  %v2746_v3 = vmul.f32 %v2019_v56, %v2718_v55  ;;  %v2761_v11 = vmul.f32 %v2027_v59, %v804_v54  ;;  %v2772_v17 = vmul.f32 %v2034_v63, %v2718_v55  ;;  %v2058_v47 = vld [vmem:[%s3431_s11 + $0x200] sm:$0xff]  ;;  %v2029_v59 = vld [vmem:[%s3431_s11 + $0xd8] sm:$0xff] }
 0x11e   : > { %v2729_v60 = vmax.f32 %v757_v52, 0.0  ;;  %v760_v62 = vadd.f32 %v2135_v53, %v2686_v30  ;;  %v2774_v18 = vmul.f32 %v2042_v0, %v804_v54 }
 0x120   : > { %v789_v6 = vrot.slane %v2729_v60, 7  ;;  %v2755_v7 = vmax.f32 %v760_v62, 0.0  ;;  %v2136_v8 = vpop.f32.mrb[8].mxu0  ;;  %v824_v10 = vmax.f32 %v2729_v60, %v816_v58  ;;  %v842_v12 = vmul.f32 %v2013_v61, %v2729_v60  ;;  %v810_v58 = vld [vmem:[%s3431_s11 + $0x20] sm:$0xff] }
 0x121   : > { %v2137_v14 = vpop.f32.mrb[9].mxu0  ;;  %v857_v15 = vrot.slane %v2729_v60, 1  ;;  %v2786_v29 = vmul.f32 %v2051_v4, %v2729_v60  ;;  %v2016_v60 = vld [vmem:[%s3431_s11 + $0x70] sm:$0xff] }
 0x122   : > { %v790_v19 = vrot.slane %v2755_v7, 7  ;;  %v2138_v20 = vadd.f32 %v2137_v14, %v2136_v8  ;;  %v2139_v21 = vpop.f32.mrb[10].mxu0  ;;  %v803_v22 = vsel %vm797_vm1, %v788_v44, %v789_v6  ;;  %v849_v33 = vmax.f32 %v824_v10, %v841_v2  ;;  %v2021_v44 = vld [vmem:[%s3431_s11 + $0x98] sm:$0xff] }
 0x123   : > { %v2140_v31 = vpop.f32.mrb[11].mxu0  ;;  %v817_v32 = vmul.f32 %v809_v9, %v803_v22  ;;  %v858_v34 = vrot.slane %v2755_v7, 1  ;;  %v869_v35 = vsel %vm863_vm2, %v856_v48, %v857_v15  ;;  %v843_v38 = vmul.f32 %v2014_v13, %v2755_v7  ;;  %v2015_v48 = vld [vmem:[%s3431_s11 + $0x68] sm:$0xff] }
 0x124   : > { %v765_v40 = vadd.f32 %v2138_v20, %v2686_v30  ;;  %v2141_v42 = vadd.f32 %v2140_v31, %v2139_v21  ;;  %v883_v45 = vmul.f32 %v2020_v16, %v869_v35  ;;  %v908_v51 = vmul.f32 %v2028_v23, %v803_v22  ;;  %v2022_v20 = vld [vmem:[%s3431_s11 + $0xa0] sm:$0xff] }
 0x125   : > { %v825_v49 = vmax.f32 %v2755_v7, %v817_v32  ;;  %v2811_v50 = vsel %vm863_vm2, %v857_v15, %v858_v34  ;;  %v2813_v52 = vmul.f32 %v2035_v25, %v869_v35  ;;  %v2818_v57 = vmul.f32 %v2043_v36, %v803_v22 }
 0x126   : > { %v2815_v53 = vmax.f32 %v765_v40, 0.0  ;;  %v768_v54 = vadd.f32 %v2141_v42, %v2686_v30  ;;  %v891_v56 = vmax.f32 %v849_v33, %v883_v45  ;;  %v884_v62 = vmul.f32 %v2021_v44, %v2811_v50  ;;  %v2023_v42 = vld [vmem:[%s3431_s11 + $0xa8] sm:$0xff]  ;;  %v2037_v44 = vld [vmem:[%s3431_s11 + $0x158] sm:$0xff] }
 0x127   : > { %v850_v61 = vmax.f32 %v825_v49, %v842_v12  ;;  %v2831_v63 = vmul.f32 %v2036_v46, %v2811_v50  ;;  %v2833_v0 = vmul.f32 %v2058_v47, %v869_v35  ;;  %v802_v10 = vsel %vm797_vm1, %v789_v6, %v790_v19  ;;  %v811_v12 = vld [vmem:[%s3431_s11 + $0x28] sm:$0xff] }
 0x128   : > { %v791_v2 = vrot.slane %v2815_v53, 7  ;;  %v844_v4 = vmul.f32 %v2015_v48, %v2815_v53  ;;  %v2837_v8 = vmax.f32 %v768_v54, 0.0  ;;  %v2142_v9 = vpop.f32.mrb[12].mxu0  ;;  %v818_v15 = vmul.f32 %v810_v58, %v802_v10  ;;  %v2038_v48 = vld [vmem:[%s3431_s11 + $0x160] sm:$0xff] }
 0x129   : > { %v2143_v13 = vpop.f32.mrb[13].mxu0  ;;  %v892_v14 = vmax.f32 %v850_v61, %v884_v62  ;;  %v859_v16 = vrot.slane %v2815_v53, 1  ;;  %v909_v21 = vmul.f32 %v2029_v59, %v802_v10  ;;  %v916_v47 = vmax.f32 %v891_v56, %v908_v51  ;;  %v2044_v62 = vld [vmem:[%s3431_s11 + $0x190] sm:$0xff] }
 0x12a   : > { %v792_v22 = vrot.slane %v2837_v8, 7  ;;  %v2850_v23 = vmul.f32 %v2016_v60, %v2837_v8  ;;  %v2144_v6 = vadd.f32 %v2143_v13, %v2142_v9  ;;  %v2145_v25 = vpop.f32.mrb[14].mxu0  ;;  %v2856_v31 = vsel %vm797_vm1, %v790_v19, %v791_v2  ;;  %v2052_v9 = vld [vmem:[%s3431_s11 + $0x1d0] sm:$0xff] }
 0x12b   : > { %v2146_v32 = vpop.f32.mrb[15].mxu0  ;;  %v819_v33 = vmul.f32 %v811_v12, %v2856_v31  ;;  %v826_v35 = vmax.f32 %v2815_v53, %v818_v15  ;;  %v860_v36 = vrot.slane %v2837_v8, 1  ;;  %v867_v40 = vsel %vm863_vm2, %v858_v34, %v859_v16  ;;  %v2017_v34 = vld [vmem:[%s3431_s11 + $0x78] sm:$0xff]  ;;  %v2010_v12 = vld [vmem:[%s3431_s11 + $0x40] sm:$0xff] }
 0x12c   : > { %v773_v19 = vadd.f32 %v2144_v6, %v2686_v30  ;;  %v2147_v45 = vadd.f32 %v2146_v32, %v2145_v25  ;;  %v2870_v46 = vmul.f32 %v2022_v20, %v867_v40  ;;  %v917_v59 = vmax.f32 %v892_v14, %v909_v21  ;;  %v2061_v32 = vld [vmem:[%s3431_s11 + $0x218] sm:$0xff] }
 0x12d   : > { %v827_v49 = vmax.f32 %v2837_v8, %v819_v33  ;;  %v2879_v54 = vmax.f32 %v826_v35, %v843_v38  ;;  %v866_v58 = vsel %vm863_vm2, %v859_v16, %v860_v36  ;;  %v934_v61 = vmul.f32 %v2037_v44, %v867_v40  ;;  %v2045_v38 = vld [vmem:[%s3431_s11 + $0x198] sm:$0xff] }
 0x12e   : > { %v2885_v60 = vmax.f32 %v773_v19, 0.0  ;;  %v776_v51 = vadd.f32 %v2147_v45, %v2686_v30  ;;  %v2888_v56 = vmul.f32 %v2023_v42, %v866_v58  ;;  %v2906_v14 = vmul.f32 %v2038_v48, %v866_v58  ;;  %v2053_v16 = vld [vmem:[%s3431_s11 + $0x1d8] sm:$0xff]  ;;  %v807_v48 = vld [vmem:[%s3431_s11 + $0x8] sm:$0xff] }
 0x12f   : > { %v2902_v30 = vmax.f32 %v827_v49, %v844_v4  ;;  %v893_v13 = vmax.f32 %v2879_v54, %v2870_v46  ;;  %v941_v15 = vmax.f32 %v916_v47, %v2831_v63  ;;  %v942_v25 = vmax.f32 %v917_v59, %v934_v61  ;;  %v2060_v4 = vld [vmem:[%s3431_s11 + $0x210] sm:$0xff]  ;;  %v806_v63 = vld [vmem:[%s3431_s11] sm:$0xff]  ;;  %v2055_v46 = vld [vmem:[%s3431_s11 + $0x1e8] sm:$0xff] }
 0x130   : > { %v793_v20 = vrot.slane %v2885_v60, 7  ;;  %v846_v21 = vmul.f32 %v2017_v34, %v2885_v60  ;;  %v2914_v6 = vmax.f32 %v776_v51, 0.0  ;;  %v958_v35 = vmul.f32 %v2044_v62, %v802_v10  ;;  %v2018_v34 = vld [vmem:[%s3431_s11 + $0x80] sm:$0xff]  ;;  %v813_v62 = vld [vmem:[%s3431_s11 + $0x38] sm:$0xff] }
 0x131   : > { %v894_v33 = vmax.f32 %v2902_v30, %v2888_v56  ;;  %v959_v42 = vmul.f32 %v2045_v38, %v2856_v31  ;;  %v983_v44 = vmul.f32 %v2052_v9, %v2755_v7  ;;  %v2026_v10 = vld [vmem:[%s3431_s11 + $0xc0] sm:$0xff]  ;;  %v984_v7 = vmul.f32 %v2053_v16, %v2815_v53  ;;  %v2063_v30 = vld [vmem:[%s3431_s11 + $0x228] sm:$0xff] }
 0x132   : > { %v794_v19 = vrot.slane %v2914_v6, 7  ;;  %v839_v45 = vmul.f32 %v2010_v12, %v2914_v6  ;;  %v862_v47 = vrot.slane %v2914_v6, 1  ;;  %v966_v49 = vmax.f32 %v941_v15, %v958_v35  ;;  %v812_v12 = vld [vmem:[%s3431_s11 + $0x30] sm:$0xff]  ;;  %v2062_v54 = vld [vmem:[%s3431_s11 + $0x220] sm:$0xff] }
 0x133   : > { %v967_v59 = vmax.f32 %v942_v25, %v959_v42  ;;  %v1008_v51 = vmul.f32 %v2060_v4, %v867_v40  ;;  %v1009_v61 = vmul.f32 %v2061_v32, %v866_v58  ;;  %v2965_v58 = vsel %vm797_vm1, %v792_v22, %v793_v20 }
 0x134   : > { %v2947_v38 = vsel %vm797_vm1, %v793_v20, %v794_v19  ;;  %v2953_v9 = vsel %vm797_vm1, %v794_v19, %v787_v41  ;;  %v2959_v40 = vsel %vm863_vm2, %v862_v47, %v855_v43  ;;  %v2030_v43 = vld [vmem:[%s3431_s11 + $0xe0] sm:$0xff]  ;;  %v991_v4 = vmax.f32 %v966_v49, %v983_v44  ;;  %v2025_v44 = vld [vmem:[%s3431_s11 + $0xb8] sm:$0xff] }
 0x135   : > { %v814_v15 = vmul.f32 %v806_v63, %v2947_v38  ;;  %v815_v41 = vmul.f32 %v807_v48, %v2953_v9  ;;  %v881_v16 = vmul.f32 %v2018_v34, %v2959_v40  ;;  %v906_v25 = vmul.f32 %v2026_v10, %v2953_v9 }
 0x136   : > { %v992_v32 = vmax.f32 %v967_v59, %v984_v7  ;;  %v800_v20 = vsel %vm797_vm1, %v791_v2, %v792_v22  ;;  %v821_v63 = vmul.f32 %v813_v62, %v2965_v58  ;;  %v861_v48 = vrot.slane %v2885_v60, 1  ;;  %v2024_v2 = vld [vmem:[%s3431_s11 + $0xb0] sm:$0xff] }
 0x137   : > { %v822_v35 = vmax.f32 %v2689_v37, %v814_v15  ;;  %v823_v42 = vmax.f32 %v2692_v39, %v815_v41  ;;  %v820_v19 = vmul.f32 %v812_v12, %v800_v20  ;;  %v2990_v34 = vmax.f32 %v991_v4, %v1008_v51  ;;  %v2031_v51 = vld [vmem:[%s3431_s11 + $0xe8] sm:$0xff]  ;;  %v2040_v4 = vld [vmem:[%s3431_s11 + $0x170] sm:$0xff] }
 0x138   : > { %v2992_v10 = vmax.f32 %v992_v32, %v1009_v61  ;;  %v829_v53 = vmax.f32 %v2914_v6, %v821_v63  ;;  %v910_v22 = vmul.f32 %v2030_v43, %v2856_v31  ;;  %v864_v59 = vsel %vm863_vm2, %v861_v48, %v862_v47  ;;  %v2039_v61 = vld [vmem:[%s3431_s11 + $0x168] sm:$0xff] }
 0x139   : > { %v847_v39 = vmax.f32 %v822_v35, %v839_v45  ;;  %v848_v7 = vmax.f32 %v823_v42, %v2742_v1  ;;  %v828_v49 = vmax.f32 %v2885_v60, %v820_v19  ;;  %v2059_v31 = vld [vmem:[%s3431_s11 + $0x208] sm:$0xff]  ;;  %v865_v47 = vsel %vm863_vm2, %v860_v36, %v861_v48 }
 0x13a   : > { %v1025_v1 = vpack.c.bf16 %v2992_v10, %v2990_v34  ;;  %v854_v45 = vmax.f32 %v829_v53, %v846_v21  ;;  %v888_v62 = vmul.f32 %v2025_v44, %v864_v59  ;;  %v887_v43 = vmul.f32 %v2024_v2, %v865_v47  ;;  %v2046_v21 = vld [vmem:[%s3431_s11 + $0x1a0] sm:$0xff] }
 0x13b   : > { %v889_v12 = vmax.f32 %v847_v39, %v881_v16  ;;  %v890_v15 = vmax.f32 %v848_v7, %v2746_v3  ;;  %v853_v41 = vmax.f32 %v828_v49, %v2850_v23  ;;  %v911_v63 = vmul.f32 %v2031_v51, %v800_v20  ;;  %v2047_v3 = vld [vmem:[%s3431_s11 + $0x1a8] sm:$0xff]  ;;  %v2054_v23 = vld [vmem:[%s3431_s11 + $0x1e0] sm:$0xff] }
 0x13c   : > { %v896_v32 = vmax.f32 %v854_v45, %v888_v62  ;;  %v918_v36 = vmax.f32 %v893_v13, %v910_v22  ;;  %v936_v16 = vmul.f32 %v2039_v61, %v865_v47  ;;  %v1007_v19 = vmul.f32 %v2059_v31, %v2811_v50  ;;  %v2033_v50 = vld [vmem:[%s3431_s11 + $0xf8] sm:$0xff]  ;;  %v2048_v61 = vld [vmem:[%s3431_s11 + $0x1b0] sm:$0xff] }
 0x13d   : > { %v914_v35 = vmax.f32 %v889_v12, %v906_v25  ;;  %v915_v42 = vmax.f32 %v890_v15, %v2761_v11  ;;  %v895_v48 = vmax.f32 %v853_v41, %v887_v43  ;;  %v919_v13 = vmax.f32 %v894_v33, %v911_v63  ;;  %v2032_v11 = vld [vmem:[%s3431_s11 + $0xf0] sm:$0xff]  ;;  %v2049_v31 = vld [vmem:[%s3431_s11 + $0x1b8] sm:$0xff] }
 0x13e   : > { %v937_v44 = vmul.f32 %v2040_v4, %v864_v59  ;;  %v943_v25 = vmax.f32 %v918_v36, %v2906_v14  ;;  %v960_v53 = vmul.f32 %v2046_v21, %v800_v20  ;;  %v961_v39 = vmul.f32 %v2047_v3, %v2965_v58  ;;  %v2041_v14 = vld [vmem:[%s3431_s11 + $0x178] sm:$0xff]  ;;  %v2064_v3 = vld [vmem:[%s3431_s11 + $0x230] sm:$0xff] }
 0x13f   : > { %v939_v2 = vmax.f32 %v914_v35, %v2772_v17  ;;  %v940_v22 = vmax.f32 %v915_v42, %v2813_v52  ;;  %v985_v56 = vmul.f32 %v2054_v23, %v2837_v8  ;;  %v944_v33 = vmax.f32 %v919_v13, %v936_v16  ;;  %v2057_v15 = vld [vmem:[%s3431_s11 + $0x1f8] sm:$0xff] }
 0x140   : > { %v968_v20 = vmax.f32 %v943_v25, %v960_v53  ;;  %v986_v7 = vmul.f32 %v2055_v46, %v2885_v60  ;;  %v1010_v49 = vmul.f32 %v2062_v54, %v865_v47  ;;  %v912_v51 = vmul.f32 %v2032_v11, %v2965_v58 }
 0x141   : > { %v964_v17 = vmax.f32 %v939_v2, %v2774_v18  ;;  %v965_v52 = vmax.f32 %v940_v22, %v2818_v57  ;;  %v913_v8 = vmul.f32 %v2033_v50, %v2947_v38  ;;  %v969_v45 = vmax.f32 %v944_v33, %v961_v39 }
 0x142   : > { %v993_v62 = vmax.f32 %v968_v20, %v985_v56  ;;  %v1011_v60 = vmul.f32 %v2063_v30, %v864_v59  ;;  %v938_v47 = vmul.f32 %v2041_v14, %v2959_v40  ;;  %v920_v58 = vmax.f32 %v895_v48, %v912_v51  ;;  %v2056_v59 = vld [vmem:[%s3431_s11 + $0x1f0] sm:$0xff] }
 0x143   : > { %v989_v18 = vmax.f32 %v964_v17, %v2752_v5  ;;  %v990_v57 = vmax.f32 %v965_v52, %v2786_v29  ;;  %v921_v12 = vmax.f32 %v896_v32, %v913_v8  ;;  %v994_v41 = vmax.f32 %v969_v45, %v986_v7  ;;  %v2343_v17 = vld [vmem:[%s3424_s4] sm:$0xff]  }
 0x144   : > { %v1018_v43 = vmax.f32 %v993_v62, %v1010_v49  ;;  %v962_v4 = vmul.f32 %v2048_v61, %v2947_v38  ;;  %v963_v21 = vmul.f32 %v2049_v31, %v2953_v9  ;;  %v945_v29 = vmax.f32 %v920_v58, %v937_v44  ;;  %v2065_v38 = vld [vmem:[%s3431_s11 + $0x238] sm:$0xff] }
 0x145   : > { %v1014_v5 = vmax.f32 %v989_v18, %v2833_v0  ;;  %v1015_v63 = vmax.f32 %v990_v57, %v1007_v19  ;;  %v946_v36 = vmax.f32 %v921_v12, %v938_v47  ;;  %v1019_v32 = vmax.f32 %v994_v41, %v1011_v60 }
 0x146   : > { %v988_v16 = vmul.f32 %v2057_v15, %v2689_v37  ;;  %v970_v23 = vmax.f32 %v945_v29, %v962_v4  ;;  %v987_v42 = vmul.f32 %v2056_v59, %v2914_v6  ;;  %v1012_v46 = vmul.f32 %v2064_v3, %v2959_v40  ;;  %v2340_v6 = vld [vmem:[%s3432_s12] sm:$0xff]   ;;  %v2344_v4 = vld [vmem:[%s3424_s4 + $0x8] sm:$0xff]  }
 0x147   : > { %v1024_v9 = vpack.c.bf16 %v1015_v63, %v1014_v5  ;;  %v971_v35 = vmax.f32 %v946_v36, %v963_v21  ;;  %v1026_v0 = vpack.c.bf16 %v1019_v32, %v1018_v43  ;;  %v1013_v37 = vmul.f32 %v2065_v38, %v2718_v55  ;;  %v2341_v55 = vld [vmem:[%s3422_s2] sm:$0xff]   ;;  %v2345_v5 = vld [vmem:[%s3424_s4 + $0x10] sm:$0xff]   ;;  %v2346_v63 = vld [vmem:[%s3424_s4 + $0x18] sm:$0xff]  }
 0x148   : > { %v995_v19 = vmax.f32 %v970_v23, %v987_v42  ;;  %v1140_v11 = vsub.s32 2, %v2675_v26  ;;  %v2347_v29 = vld [vmem:[%s3424_s4 + $0x20] ss:$0 sps:$4 sm:$0xff]  }
 0x149   : > { %2174 = vmatpush3.bf16.msra.mxu1 %v1024_v9  ;;  %v996_v48 = vmax.f32 %v971_v35, %v988_v16  ;;  %v1347_v36 = vsel %vm1345_vm8, %v2347_v29, 0 }
 0x14a   : > { %2175 = vmatprep.subr.bf16.mxu1 %v2459_v24  ;;  %v1020_v54 = vmax.f32 %v995_v19, %v1012_v46  ;;  %v1141_v50 = vrot.slane %v2681_v28, %v1140_v11 }
 0x14b   : > { %v1021_v13 = vmax.f32 %v996_v48, %v1013_v37 }
 0x14d   : > { %2176 = vmatpush3.bf16.msra.mxu1 %v1025_v1  ;;  %v1027_v44 = vpack.c.bf16 %v1021_v13, %v1020_v54  ;;  %v2342_v1 = vld [vmem:[%s3423_s3] sm:$0xff]  }
 0x14e   : > { %2177 = vmatprep.subr.bf16.mxu1 %v2459_v24 }
 0x151   : > { %2178 = vmatpush3.bf16.msra.mxu1 %v1026_v0 }
 0x152   : > { %2179 = vmatprep.subr.bf16.mxu1 %v2459_v24 }
 0x155   : > { %2180 = vmatpush3.bf16.msra.mxu1 %v1027_v44 }
 0x156   : > { %2185 = vmatprep.subr.bf16.mxu1 %v2459_v24 }
 0x158   : > { %2182 = vmatmul.mubr.msk.bf16.vlgmr.msra.gmra.mrb[0].mxu1 %vm1033_vm3, %v2340_v6 }
 0x159   : > { %2186 = vmatpush3.bf16.msra.mxu1 %v2341_v55  ;;  %2187 = vmatprep.mubr.msk.bf16.mxu1 %vm2460_vm0, %v2459_v24 }
 0x15a   : > { %2191 = vmatprep.subr.bf16.mxu1 %v2459_v24 }
 0x22b   : > { %v1071_v40 = vpop.f32.mrb[0].mxu1 }
 0x22c   : > { %v2183_v34 = vpop.f32.mrb[1].mxu1 }
 0x22d   : > { %v1074_v10 = vpop.f32.mrb[2].mxu1 }
 0x22e   : > { %v1080_v25 = vpack.c.bf16 %v1074_v10, %v1071_v40  ;;  %v2184_v53 = vpop.f32.mrb[3].mxu1 }
 0x230   : > { %2188 = vmatmul.mubr.msk.bf16.vlgmr.msra.gmra.mrb[4].mxu1 %vm1091_vm4, %v1080_v25 }
 0x231   : > { %2192 = vmatpush3.bf16.msra.mxu1 %v2342_v1  ;;  %2193 = vmatprep.mubr.msk.bf16.mxu1 %vm2460_vm0, %v2459_v24 }
 0x232   : > { %2197 = vmatprep.subr.bf16.mxu1 %v2459_v24 }
 0x238   : > { %2194 = vmatmul.mubr.msk.bf16.vlgmr.msra.gmra.mrb[8].mxu1 %vm1091_vm4, %v1080_v25 }
 0x239   : > { %2207 = vmatprep.mubr.msk.bf16.mxu1 %vm2460_vm0, %v2459_v24  ;;  %2198 = vmatpush3.bf16.msra.mxu1 %v2343_v17 }
 0x23a   : > { %2199 = vmatprep.subr.bf16.mxu1 %v2459_v24 }
 0x23d   : > { %2200 = vmatpush3.bf16.msra.mxu1 %v2344_v4  ;;  %v1396_v4 = vsub.s32 4, %v2675_v26 }
 0x23e   : > { %2201 = vmatprep.subr.bf16.mxu1 %v2459_v24 }
 0x241   : > { %2202 = vmatpush3.bf16.msra.mxu1 %v2345_v5 }
 0x242   : > { %2203 = vmatprep.subr.bf16.mxu1 %v2459_v24 }
 0x245   : > { %2204 = vmatpush3.bf16.msra.mxu1 %v2346_v63 }
 0x246   : > { %2205 = vmatprep.subr.bf16.mxu1 %v2459_v24 }
 0x249   : > { %2206 = vmatpush3.bf16.msra.mxu1 %v1347_v36 }
 0x24a   : > { %2211 = vmatprep.subr.bf16.mxu1 %v2459_v24 }
 0x30b   : > { %v1182_v2 = vpop.f32.mrb[8].mxu1 }
 0x30c   : > { %v1183_v22 = vadd.f32 %v1182_v2, %v1141_v50  ;;  %v2195_v39 = vpop.f32.mrb[9].mxu1 }
 0x30d   : > { %v1185_v56 = vpop.f32.mrb[10].mxu1 }
 0x30e   : > { %v1189_v30 = vmax.f32 %v1183_v22, 0.0  ;;  %v1186_v14 = vadd.f32 %v1185_v56, %v1141_v50  ;;  %v2196_v33 = vpop.f32.mrb[11].mxu1  ;;  %v1296_v50 = vld [vmem:[%s3433_s13] sm:$0xff]  ;;  %v1297_v56 = vld [vmem:[%s3433_s13 + $0x8] sm:$0xff] }
 0x310   : > { %v1190_v20 = vmax.f32 %v1186_v14, 0.0  ;;  %1240 = vrot.lane.b32.xlu0 %v1189_v30, %s2461_s21  ;;  %v1196_v7 = vrot.slane %v1189_v30, 4  ;;  %v1201_v49 = vrot.slane %v1189_v30, 5  ;;  %v1206_v31 = vrot.slane %v1189_v30, 7 }
 0x311   : > { %v1210_v45 = vrot.slane %v1189_v30, 1  ;;  %v1191_v62 = vrot.slane %v1189_v30, 3 }
 0x312   : > { %1242 = vrot.lane.b32.xlu1 %v1190_v20, %s2461_s21  ;;  %v1197_v52 = vrot.slane %v1190_v20, 4  ;;  %v1202_v51 = vrot.slane %v1190_v20, 5  ;;  %v1207_v8 = vrot.slane %v1190_v20, 7  ;;  %v1211_v61 = vrot.slane %v1190_v20, 1 }
 0x313   : > { %v1192_v60 = vrot.slane %v1190_v20, 3 }
 0x314   : > { %v1200_v47 = vsel %vm1198_vm5, %v1197_v52, %v1196_v7  ;;  %v1205_v18 = vsel %vm1203_vm6, %v1202_v51, %v1201_v49  ;;  %v1199_v57 = vsel %vm1198_vm5, %v1196_v7, %v1197_v52  ;;  %v1204_v58 = vsel %vm1203_vm6, %v1201_v49, %v1202_v51  ;;  %v1392_v52 = vld [vmem:[%s3425_s5] sm:$0xf] }
 0x315   : > { %1216 = vrot.lane.b32.xlu0 %v1200_v47, %s3444_s27  ;;  %v1209_v12 = vsel %vm797_vm1, %v1207_v8, %v1206_v31  ;;  %v1208_v15 = vsel %vm797_vm1, %v1206_v31, %v1207_v8  ;;  %v1212_v41 = vsel %vm863_vm2, %v1210_v45, %v1211_v61  ;;  %v1213_v43 = vsel %vm863_vm2, %v1211_v61, %v1210_v45 }
 0x316   : > { %1224 = vrot.lane.b32.xlu1 %v1205_v18, %s2463_s29  ;;  %v1194_v21 = vsel %vm1193_vm7, %v1191_v62, %v1192_v60  ;;  %v1195_v59 = vsel %vm1193_vm7, %v1192_v60, %v1191_v62  ;;  %v1402_v51 = vsel %vm1345_vm8, %v1392_v52, 0  ;;  %v1312_v8 = vsub.s32 3, %v2675_v26 }
 0x317   : > { %vm1586_vm1 = vcmp.lt.s32.totalorder %v2675_v26, 6  ;;  %vm1581_vm2 = vcmp.lt.s32.totalorder %v2675_v26, 2  ;;  %vm1645_vm5 = vcmask 654336   ;;  %vm1648_vm6 = vcmask 785408  }
 0x318   : > { %v1313_v61 = vrot.slane %v2681_v28, %v1312_v8  ;;  %vm1651_vm7 = vcmask 916480  }
 0x319   : > { %1218 = vrot.lane.b32.xlu0 %v1199_v57, %s3444_s27 }
 0x31a   : > { %1226 = vrot.lane.b32.xlu1 %v1204_v58, %s2463_s29 }
 0x31d   : > { %1232 = vrot.lane.b32.xlu0 %v1209_v12, %s2464_s30 }
 0x31e   : > { %1234 = vrot.lane.b32.xlu1 %v1208_v15, %s2464_s30  ;;  %v2348_v15 = vld [vmem:[%s3426_s6] sm:$0xff]   ;;  %s2471_s30 = smov 96  }
 0x321   : > { %1248 = vrot.lane.b32.xlu0 %v1212_v41, %s2465_s17  ;;  %v2349_v41 = vld [vmem:[%s3426_s6 + $0x8] sm:$0xff]  }
 0x322   : > { %1250 = vrot.lane.b32.xlu1 %v1213_v43, %s2465_s17  ;;  %v1083_v43 = vsub.s32 1, %v2675_v26  ;;  %s3220_s17 = sand.u32 1, %s2449_s22  }
 0x323   : > { %s3443_s19 = sshll.u32 %s3220_s17, 4 }
 0x324   : > { %s3225_s20 = scalar_lea.vmem [#allocation2], %s3443_s19  ;;  %s1850_s19 = scalar_lea.sflag [#allocation3], %s3220_s17 }
 0x325   : > { %1256 = vrot.lane.b32.xlu0 %v1194_v21, %s2466_s28 }
 0x326   : > { %1258 = vrot.lane.b32.xlu1 %v1195_v59, %s2466_s28 }
 0x329   : > { %1262 = vrot.lane.b32.xlu0 %v1199_v57, %s2467_s23 }
 0x32a   : > { %1264 = vrot.lane.b32.xlu1 %v1200_v47, %s2467_s23  ;;  %s2470_s23 = smov 80  }
 0x32d   : > { %1268 = vrot.lane.b32.xlu0 %v1204_v58, %s2468_s26 }
 0x32e   : > { %1270 = vrot.lane.b32.xlu1 %v1205_v18, %s2468_s26 }
 0x382   : > { %v1241_v32 = vpop.permute.xlu0 %1240 }
 0x384   : > { %v1243_v16 = vpop.permute.xlu1 %1242 }
 0x387   : > { %v1217_v3 = vpop.permute.xlu0 %1216 }
 0x388   : > { %v1225_v38 = vpop.permute.xlu1 %1224  ;;  %v1275_v48 = vsel %vm1274_vm9, %v1195_v59, %v1217_v3  ;;  %v1397_v59 = vrot.slane %v2681_v28, %v1396_v4 }
 0x389   : > { %v1277_v54 = vsel %vm1091_vm4, %v1275_v48, %v1225_v38  ;;  %v2353_v48 = vld [vmem:[%s3428_s8 + $0x8] sm:$0xff]  }
 0x38b   : > { %v1219_v9 = vpop.permute.xlu0 %1218 }
 0x38c   : > { %v1227_v23 = vpop.permute.xlu1 %1226  ;;  %v1276_v46 = vsel %vm1274_vm9, %v1194_v21, %v1219_v9  ;;  %v1084_v21 = vrot.slane %v2681_v28, %v1083_v43 }
 0x38d   : > { %v1278_v44 = vsel %vm1091_vm4, %v1276_v46, %v1227_v23  ;;  %v2350_v23 = vld [vmem:[%s3427_s7] sm:$0xff]  }
 0x38e   : > { %v2239_v5 = vadd.f32 %v1397_v59, %v1084_v21 }
 0x38f   : > { %v1233_v35 = vpop.permute.xlu0 %1232 }
 0x390   : > { %v1235_v42 = vpop.permute.xlu1 %1234  ;;  %v1280_v6 = vsel %vm1279_vm10, %v1277_v54, %v1233_v35 }
 0x391   : > { %v1281_v55 = vsel %vm1279_vm10, %v1278_v44, %v1235_v42  ;;  %v1283_v34 = vsel %vm1282_vm11, %v1280_v6, %v1241_v32  ;;  %v2351_v42 = vld [vmem:[%s3427_s7 + $0x8] sm:$0xff]  }
 0x392   : > { %v1284_v25 = vsel %vm1282_vm11, %v1281_v55, %v1243_v16  ;;  %v2355_v55 = vld [vmem:[%s3428_s8 + $0x18] sm:$0xff]  }
 0x393   : > { %v1249_v0 = vpop.permute.xlu0 %1248 }
 0x394   : > { %v1251_v19 = vpop.permute.xlu1 %1250  ;;  %v1286_v1 = vsel %vm1285_vm12, %v1283_v34, %v1249_v0  ;;  %v2352_v0 = vld [vmem:[%s3428_s8] sm:$0xff]  }
 0x395   : > { %v1287_v53 = vsel %vm1285_vm12, %v1284_v25, %v1251_v19  ;;  %v2469_v19 = vmov 0  }
 0x396   : > { %1743 = vmatprep.subr.bf16.mxu0 %v2469_v19 }
 0x397   : > { %v1257_v37 = vpop.permute.xlu0 %1256  ;;  %1744 = vmatpush1.bf16.msra.mxu0 %v2352_v0 }
 0x398   : > { %v1259_v13 = vpop.permute.xlu1 %1258  ;;  %v1289_v11 = vsel %vm1288_vm13, %v1286_v1, %v1257_v37  ;;  %1745 = vmatprep.subr.bf16.mxu0 %v2469_v19  ;;  %v2354_v37 = vld [vmem:[%s3428_s8 + $0x10] sm:$0xff]  }
 0x399   : > { %v1290_v2 = vsel %vm1288_vm13, %v1287_v53, %v1259_v13  ;;  %v1522_v13 = vsub.s32 6, %v2675_v26 }
 0x39b   : > { %v1263_v40 = vpop.permute.xlu0 %1262  ;;  %1746 = vmatpush1.bf16.msra.mxu0 %v2353_v48 }
 0x39c   : > { %v1265_v10 = vpop.permute.xlu1 %1264  ;;  %v1292_v22 = vsel %vm1291_vm14, %v1289_v11, %v1263_v40  ;;  %1747 = vmatprep.subr.bf16.mxu0 %v2469_v19  ;;  %v1523_v40 = vrot.slane %v2681_v28, %v1522_v13 }
 0x39d   : > { %v1293_v30 = vsel %vm1291_vm14, %v1290_v2, %v1265_v10  ;;  %v2356_v10 = vld [vmem:[%s3428_s8 + $0x20] sm:$0xff]  }
 0x39f   : > { %v1269_v39 = vpop.permute.xlu0 %1268  ;;  %1748 = vmatpush1.bf16.msra.mxu0 %v2354_v37 }
 0x3a0   : > { %v1294_v14 = vsel %vm1033_vm3, %v1292_v22, %v1269_v39  ;;  %v1271_v33 = vpop.permute.xlu1 %1270  ;;  %1749 = vmatprep.subr.bf16.mxu0 %v2469_v19  ;;  %v2357_v22 = vld [vmem:[%s3428_s8 + $0x28] sm:$0xff]  }
 0x3a1   : > { %v1298_v20 = vmul.f32 %v1296_v50, %v1294_v14  ;;  %v1295_v7 = vsel %vm1033_vm3, %v1293_v30, %v1271_v33  ;;  %v1655_v30 = vld [vmem:[%s3434_s14 + $0x8] sm:$0xff]  ;;  %v1657_v14 = vld [vmem:[%s3434_s14 + $0x18] sm:$0xff] }
 0x3a2   : > { %v1299_v49 = vmul.f32 %v1297_v56, %v1295_v7  ;;  %v2358_v7 = vld [vmem:[%s3428_s8 + $0x30] sm:$0xff]  }
 0x3a3   : > { %1750 = vmatpush1.bf16.msra.mxu0 %v2355_v55 }
 0x3a4   : > { %v1309_v17 = vpack.c.bf16 %v1299_v49, %v1298_v20  ;;  %1751 = vmatprep.subr.bf16.mxu0 %v2469_v19 }
 0x3a6   : > { %2208 = vmatmul.mubr.msk.bf16.vlgmr.msra.gmra.mrb[12].mxu1 %vm1341_vm15, %v1309_v17 }
 0x3a7   : > { %2213 = vmatprep.mubr.msk.bf16.mxu1 %vm2460_vm0, %v2459_v24  ;;  %2212 = vmatpush3.bf16.msra.mxu1 %v1402_v51 }
 0x3a8   : > { %2217 = vmatprep.subr.bf16.mxu1 %v2459_v24  ;;  %1752 = vmatpush1.bf16.msra.mxu0 %v2356_v10  ;;  %v1684_v10 = vsub.s32 7, %v2675_v26 }
 0x3a9   : > { %1753 = vmatprep.subr.bf16.mxu0 %v2469_v19 }
 0x3ac   : > { %1754 = vmatpush1.bf16.msra.mxu0 %v2357_v22 }
 0x3ad   : > { %1755 = vmatprep.subr.bf16.mxu0 %v2469_v19 }
 0x3b0   : > { %1756 = vmatpush1.bf16.msra.mxu0 %v2358_v7 }
 0x3b1   : > { %1757 = vmatprep.subr.bf16.mxu0 %v2469_v19 }
 0x479   : > { %v1383_v31 = vpop.f32.mrb[12].mxu1 }
 0x47a   : > { %v1384_v45 = vadd.f32 %v1383_v31, %v1313_v61  ;;  %v2209_v62 = vpop.f32.mrb[13].mxu1 }
 0x47b   : > { %v1386_v60 = vpop.f32.mrb[14].mxu1  ;;  %v2360_v62 = vld [vmem:[%s3428_s8 + $0x40] sm:$0xff]  }
 0x47c   : > { %v1387_v47 = vadd.f32 %v1386_v60, %v1313_v61  ;;  %v2210_v18 = vpop.f32.mrb[15].mxu1  ;;  %v1390_v57 = vmax.f32 %v1384_v45, 0.0  ;;  %v2359_v45 = vld [vmem:[%s3428_s8 + $0x38] sm:$0xff]  }
 0x47d   : > { %1758 = vmatpush1.bf16.msra.mxu0 %v2359_v45 }
 0x47e   : > { %v1391_v58 = vmax.f32 %v1387_v47, 0.0  ;;  %1759 = vmatprep.subr.bf16.mxu0 %v2469_v19 }
 0x480   : > { %v1393_v12 = vpack.c.bf16 %v1391_v58, %v1390_v57 }
 0x481   : > { %1760 = vmatpush1.bf16.msra.mxu0 %v2360_v62 }
 0x482   : > { %2214 = vmatmul.mubr.msk.bf16.vlgmr.msra.gmra.mrb[4].mxu1 %vm1274_vm9, %v1393_v12  ;;  %2233 = vmatprep.subr.bf16.mxu0 %v2459_v24 }
 0x483   : > { %2221 = vmatprep.mubr.msk.bf16.mxu1 %vm2460_vm0, %v2459_v24  ;;  %2218 = vmatpush3.bf16.msra.mxu1 %v2348_v15 }
 0x484   : > { %2219 = vmatprep.subr.bf16.mxu1 %v2459_v24 }
 0x487   : > { %2220 = vmatpush3.bf16.msra.mxu1 %v2349_v41 }
 0x488   : > { %2225 = vmatprep.subr.bf16.mxu1 %v2459_v24 }
 0x555   : > { %v1438_v63 = vpop.f32.mrb[4].mxu1 }
 0x556   : > { %v2240_v29 = vadd.f32 %v2239_v5, %v1438_v63  ;;  %v2215_v36 = vpop.f32.mrb[5].mxu1 }
 0x557   : > { %v1441_v32 = vpop.f32.mrb[6].mxu1 }
 0x558   : > { %v1447_v16 = vmax.f32 %v2240_v29, 0.0  ;;  %v2242_v3 = vadd.f32 %v2239_v5, %v1441_v32  ;;  %v2216_v38 = vpop.f32.mrb[7].mxu1 }
 0x55a   : > { %1449 = vst [vmem:[%s3225_s20] sm:$0xff] %v1447_v16  ;;  %v1448_v9 = vmax.f32 %v2242_v3, 0.0 }
 0x55c   : > { %1450 = vst [vmem:[%s3225_s20 + $0x8] sm:$0xff] %v1448_v9  ;;  %v1455_v35 = vpack.c.bf16 %v1448_v9, %v1447_v16 }
 0x55e   : > { %2222 = vmatmul.mubr.msk.bf16.vlgmr.msra.gmra.mrb[16].mxu1 %vm1282_vm11, %v1455_v35 }
 0x55f   : > { %2226 = vmatpush3.bf16.msra.mxu1 %v2350_v23  ;;  %2229 = vmatprep.mubr.msk.bf16.mxu1 %vm2460_vm0, %v2459_v24 }
 0x560   : > { %2227 = vmatprep.subr.bf16.mxu1 %v2459_v24 }
 0x563   : > { %2228 = vmatpush3.bf16.msra.mxu1 %v2351_v42  ;;  %v1656_v42 = vld [vmem:[%s3434_s14 + $0x10] sm:$0xff] }
 0x566   : > { %2230 = vmatmul.mubr.msk.bf16.vlgmr.msra.gmra.mrb[20].mxu1 %vm1282_vm11, %v1455_v35  ;;  %v1654_v35 = vld [vmem:[%s3434_s14] sm:$0xff] }
 0x631   : > { %v3246_v46 = vpop.f32.mrb[16].mxu1 }
 0x632   : > { %v2223_v54 = vpop.f32.mrb[17].mxu1 }
 0x633   : > { %v3252_v44 = vpop.f32.mrb[18].mxu1 }
 0x634   : > { %v2224_v6 = vpop.f32.mrb[19].mxu1 }
 0x639   : > { %v1570_v34 = vpop.f32.mrb[20].mxu1 }
 0x63a   : > { %v1571_v1 = vadd.f32 %v1570_v34, %v1523_v40  ;;  %v2231_v25 = vpop.f32.mrb[21].mxu1  ;;  %v2361_v34 = vld [vmem:[%s3429_s9] sm:$0xff]  }
 0x63b   : > { %v1573_v53 = vpop.f32.mrb[22].mxu1 }
 0x63c   : > { %v1577_v11 = vmax.f32 %v1571_v1, 0.0  ;;  %v1574_v50 = vadd.f32 %v1573_v53, %v1523_v40  ;;  %v2232_v2 = vpop.f32.mrb[23].mxu1  ;;  %v2362_v1 = vld [vmem:[%s3430_s10] sm:$0xff] }
 0x63d   : > { %v1685_v25 = vrot.slane %v2362_v1, %v1684_v10 }
 0x63e   : > { %v1578_v28 = vmax.f32 %v1574_v50, 0.0  ;;  %1613 = vrot.lane.b32.xlu0 %v1577_v11, %s2468_s26  ;;  %1593 = vrot.lane.b32.xlu1 %v1577_v11, %s2463_s29  ;;  %v1584_v39 = vrot.slane %v1577_v11, 2  ;;  %v1579_v33 = vrot.slane %v1577_v11, 6 }
 0x640   : > { %v1585_v56 = vrot.slane %v1578_v28, 2  ;;  %v1580_v20 = vrot.slane %v1578_v28, 6 }
 0x642   : > { %1615 = vrot.lane.b32.xlu1 %v1578_v28, %s2468_s26  ;;  %1591 = vrot.lane.b32.xlu0 %v1578_v28, %s2463_s29  ;;  %v1588_v49 = vsel %vm1586_vm1, %v1585_v56, %v1584_v39  ;;  %v1587_v17 = vsel %vm1586_vm1, %v1584_v39, %v1585_v56  ;;  %v1583_v52 = vsel %vm1581_vm2, %v1580_v20, %v1579_v33  ;;  %s2473_s29 = smov [#allocation2]  }
 0x643   : > { %v1659_v51 = vmul.f32 %v1655_v30, %v1588_v49  ;;  %v1661_v8 = vmul.f32 %v1657_v14, %v1587_v17  ;;  %v1582_v61 = vsel %vm1581_vm2, %v1579_v33, %v1580_v20 }
 0x645   : > { %v1681_v31 = vpack.c.bf16 %v1661_v8, %v1659_v51 }
 0x646   : > { %1599 = vrot.lane.b32.xlu0 %v1588_v49, %s2461_s21  ;;  %1601 = vrot.lane.b32.xlu1 %v1587_v17, %s2461_s21  ;;  %s2472_s21 = smov 112  }
 0x647   : > { %2094 = vmatprep.mubr.msk.bf16.mxu0 %vm1091_vm4, %v1681_v31 }
 0x64a   : > { %1607 = vrot.lane.b32.xlu0 %v1583_v52, %s2466_s28  ;;  %1609 = vrot.lane.b32.xlu1 %v1582_v61, %s2466_s28 }
 0x64e   : > { %1619 = vrot.lane.b32.xlu0 %v1587_v17, %s2470_s23  ;;  %1621 = vrot.lane.b32.xlu1 %v1588_v49, %s2470_s23 }
 0x652   : > { %1625 = vrot.lane.b32.xlu0 %v1582_v61, %s2471_s30  ;;  %1627 = vrot.lane.b32.xlu1 %v1583_v52, %s2471_s30  ;;  %s1868_s30 = sshll.u32 %s3225_s20, 4  ;;  %s2367_s20 = sshll.u32 %s2473_s29, 4  ;;  %s3320_s30 = int_to_ptr.vmem [resolvable:$true] %s1868_s30  ;;  %s2368_s20 = int_to_ptr.vmem [resolvable:$false] %s2367_s20 }
 0x653   : > { %s2363_s27 = scalar_lea.vmem %s3320_s30, 256  ;;  %s2369_s26 = scalar_lea.vmem %s2368_s20, 512 }
 0x654   : > { %p2364_p11 = scmp.ne.s32.totalorder %s3320_s30, %s2363_s27  ;;  %p2370_p0 = scmp.lt.s32.totalorder %s3320_s30, %s2368_s20 }
 0x655   : > { %p2371_p1 = scmp.lt.s32.totalorder %s2369_s26, %s2363_s27 }
 0x656   : > { %1631 = vrot.lane.b32.xlu0 %v1578_v28, %s2472_s21  ;;  %1633 = vrot.lane.b32.xlu1 %v1577_v11, %s2472_s21  ;;  %s3446_s21 = sshll.u32 %s2582_s25, 8  ;;  %p2365_p12 = pnand %p2364_p11, %p2599_p5 }
 0x657   : > { %s3328_s18 = scalar_lea.hbm %s3435_s15, %s3446_s21  ;;  %p2372_p2 = por %p2371_p1, %p2370_p0 }
 0x658   : > { %p2366_p13 = pneg %p2365_p12 }
 0x65a   : > { %p2373_p3 = pnand %p2372_p2, %p2366_p13 }
 0x6b0   : > { %v1614_v60 = vpop.permute.xlu0 %1613  ;;  %v1594_v47 = vpop.permute.xlu1 %1593 }
 0x6b1   : > { %v1638_v21 = vsel %vm1091_vm4, %v1583_v52, %v1594_v47 }
 0x6b4   : > { %v1616_v18 = vpop.permute.xlu1 %1615  ;;  %v1592_v57 = vpop.permute.xlu0 %1591 }
 0x6b5   : > { %v1637_v59 = vsel %vm1091_vm4, %v1582_v61, %v1592_v57 }
 0x6b8   : > { %v1600_v58 = vpop.permute.xlu0 %1599  ;;  %v1602_v12 = vpop.permute.xlu1 %1601 }
 0x6b9   : > { %v1639_v5 = vsel %vm1282_vm11, %v1637_v59, %v1600_v58  ;;  %v1640_v63 = vsel %vm1282_vm11, %v1638_v21, %v1602_v12 }
 0x6bc   : > { %v1608_v15 = vpop.permute.xlu0 %1607  ;;  %v1610_v41 = vpop.permute.xlu1 %1609 }
 0x6bd   : > { %v1641_v29 = vsel %vm1288_vm13, %v1639_v5, %v1608_v15  ;;  %v1642_v36 = vsel %vm1288_vm13, %v1640_v63, %v1610_v41 }
 0x6be   : > { %v1643_v3 = vsel %vm1033_vm3, %v1641_v29, %v1614_v60  ;;  %v1644_v38 = vsel %vm1033_vm3, %v1642_v36, %v1616_v18 }
 0x6c0   : > { %v1620_v43 = vpop.permute.xlu0 %1619  ;;  %v1622_v4 = vpop.permute.xlu1 %1621 }
 0x6c1   : > { %v1646_v9 = vsel %vm1645_vm5, %v1643_v3, %v1620_v43  ;;  %v1647_v23 = vsel %vm1645_vm5, %v1644_v38, %v1622_v4 }
 0x6c4   : > { %v1626_v32 = vpop.permute.xlu0 %1625  ;;  %v1628_v16 = vpop.permute.xlu1 %1627 }
 0x6c5   : > { %v1649_v0 = vsel %vm1648_vm6, %v1646_v9, %v1626_v32  ;;  %v1650_v19 = vsel %vm1648_vm6, %v1647_v23, %v1628_v16 }
 0x6c8   : > { %v1632_v48 = vpop.permute.xlu0 %1631  ;;  %v1634_v37 = vpop.permute.xlu1 %1633 }
 0x6c9   : > { %v1652_v54 = vsel %vm1651_vm7, %v1649_v0, %v1632_v48  ;;  %v1653_v13 = vsel %vm1651_vm7, %v1650_v19, %v1634_v37 }
 0x6ca   : > { %v1658_v6 = vmul.f32 %v1654_v35, %v1652_v54  ;;  %v1660_v55 = vmul.f32 %v1656_v42, %v1653_v13 }
 0x6cc   : > { %v1680_v40 = vpack.c.bf16 %v1660_v55, %v1658_v6 }
 0x6ce   : > { %1776 = vmatmul.mubr.bf16.vlgmr.msra.gmra.mrb[16].mxu0 %v1680_v40 }
 0x6cf   : > { %2235 = vmatprep.mubr.msk.bf16.mxu0 %vm2460_vm0, %v2459_v24  ;;  %2234 = vmatpush3.bf16.msra.mxu0 %v2361_v34 }
 0x7a1   : > { %v1777_v53 = vpop.f32.mrb[16].mxu0 }
 0x7a2   : > { %v1778_v11 = vadd.f32 %v1777_v53, %v1685_v25  ;;  %v1779_v24 = vpop.f32.mrb[17].mxu0 }
 0x7a3   : > { %v1780_v50 = vpop.f32.mrb[18].mxu0 }
 0x7a4   : > { %v1781_v2 = vadd.f32 %v1780_v50, %v1685_v25  ;;  %v1782_v22 = vpop.f32.mrb[19].mxu0  ;;  %v1784_v28 = vmax.f32 %v1778_v11, 0.0 }
 0x7a6   : > { %v1785_v39 = vmax.f32 %v1781_v2, 0.0 }
 0x7a8   : > { %v1788_v56 = vpack.c.bf16 %v1785_v39, %v1784_v28 }
 0x7aa   : > { %2236 = vmatmul.mubr.msk.bf16.vlgmr.msra.gmra.mrb[20].mxu0 %vm1091_vm4, %v1788_v56 }
 0x7ab   : > { %2376 = shalt.err (!%p2373_p3)
}
 0x7ac   : > { %s2377_s23 = scalar_lea.hbm %s3328_s18, 256  ;;  %s2381_s29 = scalar_lea.hbm %s3435_s15, 512 }
 0x7ad   : > { %p2378_p4 = scmp.ne.s32.totalorder %s3328_s18, %s2377_s23  ;;  %p2382_p9 = scmp.lt.u32.totalorder %s3328_s18, %s3435_s15 }
 0x7ae   : > { %p2383_p10 = scmp.lt.u32.totalorder %s2381_s29, %s2377_s23  ;;  %p2385_p12 = scmp.lt.u32.totalorder %s2377_s23, %s3328_s18 }
 0x7af   : > { %p2379_p7 = pnand %p2378_p4, %p2599_p5 }
 0x7b0   : > { %p2384_p11 = por %p2383_p10, %p2382_p9 }
 0x7b1   : > { %p2380_p8 = pneg %p2379_p7 }
 0x7b2   : > { %p2386_p13 = por %p2385_p12, %p2384_p11 }
 0x7b4   : > { %p2387_p0 = pnand %p2386_p13, %p2380_p8 }
 0x7b6   : > { %2390 = shalt.err (!%p2387_p0)
}
 0x7b7   : > { %s3447_s27 = smov 128   ;;  %s3460_s26 = smov 8   ;;  %v1458_v30 = vsub.s32 5, %v2675_v26  ;;  %v533_v33 = vld [vmem:[%s3430_s10 + $0x8] sm:$0xff] }
 0x7b8   : > { %2253 = dma.vmem_to_hbm [thread:$0]  (%p2599_p5), %s3320_s30, 256, %s3328_s18, %s1850_s19, %s3447_s27, %s3447_s27, %s3460_s26   ;;  %v1792_v7 = vrot.slane %v533_v33, %v576_v27 }
 0x7b9   : > { %v1459_v14 = vrot.slane %v2362_v1, %v1458_v30  ;;  %s3461_s30 = sshll.u32 %s3220_s17, 4  ;;  %s3462_s28 = sshll.u32 %s2582_s25, 8 }
 0x7ba   : > { %s525_s18 = scalar_lea.vmem [#allocation4], %s3461_s30  ;;  %s3374_s20 = scalar_lea.hbm %s3436_s16, %s3462_s28 }
 0x7bb   : > { %v1510_v20 = vadd.f32 %v3246_v46, %v1459_v14  ;;  %v1513_v49 = vadd.f32 %v3252_v44, %v1459_v14  ;;  %s1884_s19 = sshll.u32 %s525_s18, 4  ;;  %s1855_s21 = scalar_lea.sflag [#allocation5], %s3220_s17  ;;  %s3367_s19 = int_to_ptr.vmem [resolvable:$true] %s1884_s19 }
 0x7bc   : > { %s2391_s23 = scalar_lea.vmem %s3367_s19, 256  ;;  %s2475_s30 = smov [#allocation4]  }
 0x7bd   : > { %v2244_v17 = vadd.f32 %v1792_v7, %v1510_v20  ;;  %v2247_v61 = vadd.f32 %v1792_v7, %v1513_v49  ;;  %p2392_p1 = scmp.ne.s32.totalorder %s3367_s19, %s2391_s23  ;;  %s2395_s27 = sshll.u32 %s2475_s30, 4  ;;  %s2396_s27 = int_to_ptr.vmem [resolvable:$false] %s2395_s27 }
 0x7be   : > { %s2397_s1 = scalar_lea.vmem %s2396_s27, 512  ;;  %p2398_p4 = scmp.lt.s32.totalorder %s3367_s19, %s2396_s27 }
 0x7bf   : > { %p2393_p2 = pnand %p2392_p1, %p2599_p5  ;;  %p2399_p7 = scmp.lt.s32.totalorder %s2397_s1, %s2391_s23 }
 0x7c1   : > { %p2394_p3 = pneg %p2393_p2  ;;  %p2400_p8 = por %p2399_p7, %p2398_p4 }
 0x7c3   : > { %p2401_p9 = pnand %p2400_p8, %p2394_p3 }
 0x87d   : > { %v1836_v52 = vpop.f32.mrb[20].mxu0 }
 0x87e   : > { %v2245_v51 = vadd.f32 %v2244_v17, %v1836_v52  ;;  %v2237_v8 = vpop.f32.mrb[21].mxu0 }
 0x87f   : > { %v1839_v31 = vpop.f32.mrb[22].mxu0 }
 0x880   : > { %v1845_v45 = vmax.f32 %v2245_v51, 0.0  ;;  %v2248_v62 = vadd.f32 %v2247_v61, %v1839_v31  ;;  %v2238_v46 = vpop.f32.mrb[23].mxu0 }
 0x882   : > { %1847 = vst [vmem:[%s525_s18] sm:$0xff] %v1845_v45  ;;  %v1846_v26 = vmax.f32 %v2248_v62, 0.0 }
 0x884   : > { %1848 = vst [vmem:[%s525_s18 + $0x8] sm:$0xff] %v1846_v26 }
 0x885   : > { %2404 = shalt.err (!%p2401_p9)
}
 0x886   : > { %s2405_s25 = scalar_lea.hbm %s3374_s20, 256  ;;  %s2409_s24 = scalar_lea.hbm %s3436_s16, 512 }
 0x887   : > { %p2406_p10 = scmp.ne.s32.totalorder %s3374_s20, %s2405_s25  ;;  %p2410_p13 = scmp.lt.u32.totalorder %s3374_s20, %s3436_s16 }
 0x888   : > { %p2411_p0 = scmp.lt.u32.totalorder %s2409_s24, %s2405_s25  ;;  %p2413_p2 = scmp.lt.u32.totalorder %s2405_s25, %s3374_s20 }
 0x889   : > { %p2407_p11 = pnand %p2406_p10, %p2599_p5 }
 0x88a   : > { %p2412_p1 = por %p2411_p0, %p2410_p13 }
 0x88b   : > { %p2408_p12 = pneg %p2407_p11 }
 0x88c   : > { %p2414_p3 = por %p2413_p2, %p2412_p1 }
 0x88e   : > { %p2415_p4 = pnand %p2414_p3, %p2408_p12 }
 0x890   : > { %2418 = shalt.err (!%p2415_p4)
}
 0x891   : > { %s3463_s1 = smov 128  }
 0x892   : > { %2254 = dma.vmem_to_hbm [thread:$0]  (%p2599_p5), %s3367_s19, 256, %s3374_s20, %s1855_s21, %s3463_s1, %s3463_s1, %s3460_s26  }
 0x893 PF: > { %s3464_s23 = sld [smem:[#allocation10_spill]]  ;;  %s3465_s30 = sld [smem:[#allocation8_spill]] }
 0x899   : > { %p2264_p7 = scmp.ge.s32.totalorder %s3464_s23, 2  ;;  %s1899_s28 = sand.u32 1, %s3465_s30  }
 0x89a   : > { %s1900_s25 = scalar_lea.sflag [#allocation3], %s1899_s28 }
 0x89b   : > { %p2258_p8 = pnand %p2264_p7, %p2603_p6 }
 0x89d   : > { %2436 = dma.done.wait (!%p2258_p8), %s1900_s25, 256  }
 0x89e   : > { %2438 = vsyncadd (!%p2258_p8), %s1900_s25, 4294967040  ;;  %s1909_s0 = scalar_lea.sflag [#allocation5], %s1899_s28 }
 0x89f   : > { %2440 = dma.done.wait (!%p2258_p8), %s1909_s0, 256  }
 0x8a0   : > { %2442 = vsyncadd (!%p2258_p8), %s1909_s0, 4294967040  ;;  %s3467_s24 = sld [smem:[#allocation11_spill]]  ;;  %s3468_s17 = sld [smem:[#allocation9_spill]] }
 0x8a1   : > { %s3469_s23 = sld [smem:[#allocation12_spill]]  ;;  %s3470_s21 = smov %s2449_s22 }
 0x8a6   : > { %p30_p5 = scmp.ge.s32.totalorder %s3467_s24, 4   ;;  %s3471_s22 = smov %s3468_s17 }
 0x8a8   :  { %32 = sbr.rel (!%p30_p5) target bundleno = 8 (0x8), region = 139 }
 0x8af   :  { %1914 = vsyncpa [#allocation3], 1 }
 0x8b0   :  { %1916 = vsyncpa [#allocation3 + $0x1], 1 }
 0x8b1   :  { %1917 = vsyncpa [#allocation5], 1 }
 0x8b2   :  { %1919 = vsyncpa [#allocation5 + $0x1], 1 }

</bundles_post_ra>
